<compile_context>
chip_gen: v7x
topology: tpu7x:2x2x1
jax: 0.10.0
libtpu: 0.0.40
codegen_flags: <defaults>
</compile_context>

<pallas_src>
import functools

import jax
import jax.numpy as jnp
import numpy as np
from jax import lax
from jax.experimental import pallas as pl
from jax.experimental.pallas import tpu as pltpu

HIDDEN = [128, 128, 128, 128, 128, 128]
SIZES = [4] + HIDDEN + [1]          # 7 linear layers
N_LAYERS = len(SIZES) - 1

RS = 256        # rows per in-kernel sub-tile (bounds live activation size)
TM_MAX = 2048   # max rows per grid step
MIN_STEPS = 8   # keep >= this many grid steps when M is large


def _silu(h):
    # h * sigmoid(h); sigmoid via EUP exp + EUP approx reciprocal.
    return h * pl.reciprocal(1.0 + jnp.exp(-h), approx=True)


def _mlp_kernel(rs, x_ref, *refs):
    """refs = (w0, b0, w1, b1, ..., w6t, b6, o_ref).

    w0:    [4, 128]   f32   (first layer -> VPU broadcast FMAs)
    w1..5: [128, 128] bf16  (MXU layers, f32 accumulation)
    w6t:   [1, 128]   f32   (last layer weight transposed -> VPU mul + reduce)
    b*:    [1, out]   f32
    """
    o_ref = refs[-1]
    wb = refs[:-1]
    tm = x_ref.shape[0]
    n_sub = tm // rs

    def sub_tile(s, carry):
        r0 = pl.multiple_of(s * rs, rs)
        x = x_ref[pl.ds(r0, rs), :]                       # [rs, 4] f32

        # Layer 0 (K=4): keep it off the MXU.
        w0 = wb[0][...]                                   # [4, 128] f32
        h = wb[1][...] + x[:, 0:1] * w0[0:1, :]
        for k in range(1, SIZES[0]):
            h = h + x[:, k:k + 1] * w0[k:k + 1, :]
        h = _silu(h)

        # Layers 1..5 (128x128): bf16 MXU matmuls, f32 accumulate.
        for l in range(1, N_LAYERS - 1):
            w = wb[2 * l][...]                            # [128, 128] bf16
            b = wb[2 * l + 1][...]                        # [1, 128]   f32
            h = jnp.dot(h.astype(jnp.bfloat16), w,
                        preferred_element_type=jnp.float32) + b
            h = _silu(h)

        # Layer 6 (N=1): VPU multiply + lane reduction instead of an N=1 MXU pass.
        w6t = wb[2 * (N_LAYERS - 1)][...]                 # [1, 128] f32
        b6 = wb[2 * (N_LAYERS - 1) + 1][...]              # [1, 1]   f32
        y = jnp.sum(h * w6t, axis=-1, keepdims=True) + b6
        o_ref[pl.ds(r0, rs), :] = y.astype(o_ref.dtype)
        return carry

    lax.fori_loop(0, n_sub, sub_tile, 0, unroll=True)


def _pick_tm(m):
    """Row-tile heuristic: big tiles for overhead amortization, but keep
    >= MIN_STEPS grid steps when possible (megacore / pipeline)."""
    if m <= RS:
        return max(8, ((m + 7) // 8) * 8)
    tm = TM_MAX
    while tm > RS and pl.cdiv(m, tm) < MIN_STEPS:
        tm //= 2
    return max(tm, RS)


@functools.partial(jax.jit, static_argnames=("tm",))
def mlp_vector_field(x_t, coords, t_path, params, tm=None):
    """params: list of (w[in,out], b[out]) for each of the 7 linear layers."""
    x = jnp.concatenate([x_t, coords, t_path], axis=-1)   # [..., 4]
    lead = x.shape[:-1]
    M = int(np.prod(lead))
    if tm is None:
        tm = _pick_tm(M)
    rs = min(RS, tm)
    assert tm % rs == 0

    x2 = x.reshape(M, SIZES[0]).astype(jnp.float32)
    m_pad = pl.cdiv(M, tm) * tm
    if m_pad != M:
        x2 = jnp.pad(x2, ((0, m_pad - M), (0, 0)))

    # Flatten params with per-layer dtypes / layouts.
    flat = []
    for l, (w, b) in enumerate(params):
        if l == 0:
            flat.append(w.astype(jnp.float32))               # [4, 128]
        elif l == N_LAYERS - 1:
            flat.append(w.reshape(1, -1).astype(jnp.float32))  # [1, 128] (= w.T)
        else:
            flat.append(w.astype(jnp.bfloat16))              # [128, 128]
        flat.append(b.reshape(1, -1).astype(jnp.float32))    # [1, out]

    in_specs = [pl.BlockSpec((tm, SIZES[0]), lambda i: (i, 0))]
    for p in flat:
        # Default-arg binds rank now (avoids late-binding bug).
        in_specs.append(pl.BlockSpec(p.shape, lambda i, _r=p.ndim: (0,) * _r))

    out = pl.pallas_call(
        functools.partial(_mlp_kernel, rs),
        out_shape=jax.ShapeDtypeStruct((m_pad, SIZES[-1]), jnp.float32),
        grid_spec=pltpu.PrefetchScalarGridSpec(
            num_scalar_prefetch=0,
            grid=(m_pad // tm,),
            in_specs=in_specs,
            out_specs=pl.BlockSpec((tm, SIZES[-1]), lambda i: (i, 0)),
        ),
        compiler_params=pltpu.CompilerParams(
            dimension_semantics=("parallel",)),
    )(x2, *flat)

    return out[:M].reshape(lead + (SIZES[-1],))


def init_params(key):
    """Deterministic synthetic init (same shapes as nn.Linear layers)."""
    params = []
    for i in range(len(SIZES) - 1):
        key, kw, kb = jax.random.split(key, 3)
        fan_in = SIZES[i]
        bound = 1.0 / np.sqrt(fan_in)
        w = jax.random.uniform(kw, (SIZES[i], SIZES[i + 1]),
                               jnp.float32, -bound, bound)
        b = jax.random.uniform(kb, (SIZES[i + 1],), jnp.float32, -bound, bound)
        params.append((w, b))
    return params


def _reference(x_t, coords, t_path, params):
    h = jnp.concatenate([x_t, coords, t_path], axis=-1).astype(jnp.float32)
    n = len(params)
    for l, (w, b) in enumerate(params):
        h = h @ w + b
        if l < n - 1:
            h = h * jax.nn.sigmoid(h)
    return h


if __name__ == "__main__":
    key = jax.random.PRNGKey(0)
    key, k1, k2, k3, kp = jax.random.split(key, 5)

    B, N = 2, 64
    x_t = jax.random.normal(k1, (B, N, 1), jnp.float32)
    coords = jax.random.normal(k2, (B, N, 2), jnp.float32)
    t_path = jax.random.uniform(k3, (B, N, 1), jnp.float32)

    params = init_params(kp)

    out = mlp_vector_field(x_t, coords, t_path, params)
    out = jax.block_until_ready(out)

    ref = _reference(x_t, coords, t_path, params)
    assert out.shape == (B, N, 1), out.shape
    # Tolerance loosened vs the f32 reference: middle layers use bf16 MXU
    # inputs (f32 accumulation) and SiLU uses the EUP approx reciprocal.
    np.testing.assert_allclose(np.asarray(out), np.asarray(ref),
                               rtol=5e-2, atol=5e-2)
    print("KERNEL_OK")
</pallas_src>

<mosaic_0001>
module attributes {stable_mosaic.version = 11 : i64} {
  func.func @_mlp_kernel(%arg0: i32, %arg1: memref<128x4xf32, #tpu.memory_space<vmem>>, %arg2: memref<4x128xf32, #tpu.memory_space<vmem>>, %arg3: memref<1x128xf32, #tpu.memory_space<vmem>>, %arg4: memref<128x128xbf16, #tpu.memory_space<vmem>>, %arg5: memref<1x128xf32, #tpu.memory_space<vmem>>, %arg6: memref<128x128xbf16, #tpu.memory_space<vmem>>, %arg7: memref<1x128xf32, #tpu.memory_space<vmem>>, %arg8: memref<128x128xbf16, #tpu.memory_space<vmem>>, %arg9: memref<1x128xf32, #tpu.memory_space<vmem>>, %arg10: memref<128x128xbf16, #tpu.memory_space<vmem>>, %arg11: memref<1x128xf32, #tpu.memory_space<vmem>>, %arg12: memref<128x128xbf16, #tpu.memory_space<vmem>>, %arg13: memref<1x128xf32, #tpu.memory_space<vmem>>, %arg14: memref<1x128xf32, #tpu.memory_space<vmem>>, %arg15: memref<1x1xf32, #tpu.memory_space<vmem>>, %arg16: memref<128x1xf32, #tpu.memory_space<vmem>>) attributes {dimension_semantics = [#tpu.dimension_semantics<parallel>], iteration_bounds = array<i64: 1>, scalar_prefetch = 0 : i64, scratch_operands = 0 : i64, tpu.core_type = #tpu.core_type<tc>, window_params = [{transform_indices = @transform_0, window_bounds = array<i64: 128, 4>}, {pipeline_mode = #tpu.pipeline_mode<synchronous>, transform_indices = @transform_1, window_bounds = array<i64: 4, 128>}, {pipeline_mode = #tpu.pipeline_mode<synchronous>, transform_indices = @transform_2, window_bounds = array<i64: 1, 128>}, {pipeline_mode = #tpu.pipeline_mode<synchronous>, transform_indices = @transform_3, window_bounds = array<i64: 128, 128>}, {pipeline_mode = #tpu.pipeline_mode<synchronous>, transform_indices = @transform_4, window_bounds = array<i64: 1, 128>}, {pipeline_mode = #tpu.pipeline_mode<synchronous>, transform_indices = @transform_5, window_bounds = array<i64: 128, 128>}, {pipeline_mode = #tpu.pipeline_mode<synchronous>, transform_indices = @transform_6, window_bounds = array<i64: 1, 128>}, {pipeline_mode = #tpu.pipeline_mode<synchronous>, transform_indices = @transform_7, window_bounds = array<i64: 128, 128>}, {pipeline_mode = #tpu.pipeline_mode<synchronous>, transform_indices = @transform_8, window_bounds = array<i64: 1, 128>}, {pipeline_mode = #tpu.pipeline_mode<synchronous>, transform_indices = @transform_9, window_bounds = array<i64: 128, 128>}, {pipeline_mode = #tpu.pipeline_mode<synchronous>, transform_indices = @transform_10, window_bounds = array<i64: 1, 128>}, {pipeline_mode = #tpu.pipeline_mode<synchronous>, transform_indices = @transform_11, window_bounds = array<i64: 128, 128>}, {pipeline_mode = #tpu.pipeline_mode<synchronous>, transform_indices = @transform_12, window_bounds = array<i64: 1, 128>}, {pipeline_mode = #tpu.pipeline_mode<synchronous>, transform_indices = @transform_13, window_bounds = array<i64: 1, 128>}, {pipeline_mode = #tpu.pipeline_mode<synchronous>, transform_indices = @transform_14, window_bounds = array<i64: 1, 1>}, {transform_indices = @transform_15, window_bounds = array<i64: 128, 1>}]} {
    %c0_i32 = arith.constant 0 : i32
    %c128_i32 = arith.constant 128 : i32
    %0 = arith.muli %c0_i32, %c128_i32 : i32
    %1 = tpu.assume_multiple %0, 128 : i32
    %2 = arith.index_cast %1 : i32 to index
    %c0 = arith.constant 0 : index
    %3 = vector.load %arg1[%2, %c0] : memref<128x4xf32, #tpu.memory_space<vmem>>, vector<128x4xf32>
    %c0_0 = arith.constant 0 : index
    %c0_1 = arith.constant 0 : index
    %4 = vector.load %arg2[%c0_0, %c0_1] : memref<4x128xf32, #tpu.memory_space<vmem>>, vector<4x128xf32>
    %c0_2 = arith.constant 0 : index
    %c0_3 = arith.constant 0 : index
    %5 = vector.load %arg3[%c0_2, %c0_3] : memref<1x128xf32, #tpu.memory_space<vmem>>, vector<1x128xf32>
    %6 = vector.extract_strided_slice %3 {offsets = [0, 0], sizes = [128, 1], strides = [1, 1]} : vector<128x4xf32> to vector<128x1xf32>
    %7 = vector.extract_strided_slice %4 {offsets = [0, 0], sizes = [1, 128], strides = [1, 1]} : vector<4x128xf32> to vector<1x128xf32>
    %8 = vector.broadcast %6 : vector<128x1xf32> to vector<128x128xf32>
    %9 = vector.broadcast %7 : vector<1x128xf32> to vector<128x128xf32>
    %10 = arith.mulf %8, %9 : vector<128x128xf32>
    %11 = vector.broadcast %5 : vector<1x128xf32> to vector<128x128xf32>
    %12 = arith.addf %11, %10 : vector<128x128xf32>
    %13 = vector.extract_strided_slice %3 {offsets = [0, 1], sizes = [128, 1], strides = [1, 1]} : vector<128x4xf32> to vector<128x1xf32>
    %14 = vector.extract_strided_slice %4 {offsets = [1, 0], sizes = [1, 128], strides = [1, 1]} : vector<4x128xf32> to vector<1x128xf32>
    %15 = vector.broadcast %13 : vector<128x1xf32> to vector<128x128xf32>
    %16 = vector.broadcast %14 : vector<1x128xf32> to vector<128x128xf32>
    %17 = arith.mulf %15, %16 : vector<128x128xf32>
    %18 = arith.addf %12, %17 : vector<128x128xf32>
    %19 = vector.extract_strided_slice %3 {offsets = [0, 2], sizes = [128, 1], strides = [1, 1]} : vector<128x4xf32> to vector<128x1xf32>
    %20 = vector.extract_strided_slice %4 {offsets = [2, 0], sizes = [1, 128], strides = [1, 1]} : vector<4x128xf32> to vector<1x128xf32>
    %21 = vector.broadcast %19 : vector<128x1xf32> to vector<128x128xf32>
    %22 = vector.broadcast %20 : vector<1x128xf32> to vector<128x128xf32>
    %23 = arith.mulf %21, %22 : vector<128x128xf32>
    %24 = arith.addf %18, %23 : vector<128x128xf32>
    %25 = vector.extract_strided_slice %3 {offsets = [0, 3], sizes = [128, 1], strides = [1, 1]} : vector<128x4xf32> to vector<128x1xf32>
    %26 = vector.extract_strided_slice %4 {offsets = [3, 0], sizes = [1, 128], strides = [1, 1]} : vector<4x128xf32> to vector<1x128xf32>
    %27 = vector.broadcast %25 : vector<128x1xf32> to vector<128x128xf32>
    %28 = vector.broadcast %26 : vector<1x128xf32> to vector<128x128xf32>
    %29 = arith.mulf %27, %28 : vector<128x128xf32>
    %30 = arith.addf %24, %29 : vector<128x128xf32>
    %cst = arith.constant 0.000000e+00 : f32
    %31 = vector.broadcast %cst : f32 to vector<128x128xf32>
    %32 = arith.subf %31, %30 : vector<128x128xf32>
    %33 = math.exp %32 : vector<128x128xf32>
    %cst_4 = arith.constant 1.000000e+00 : f32
    %34 = vector.broadcast %cst_4 : f32 to vector<128x128xf32>
    %35 = arith.addf %34, %33 : vector<128x128xf32>
    %36 = tpu.reciprocal %35 {approx = true} : vector<128x128xf32> -> vector<128x128xf32>
    %37 = arith.mulf %30, %36 : vector<128x128xf32>
    %c0_5 = arith.constant 0 : index
    %c0_6 = arith.constant 0 : index
    %38 = vector.load %arg4[%c0_5, %c0_6] : memref<128x128xbf16, #tpu.memory_space<vmem>>, vector<128x128xbf16>
    %c0_7 = arith.constant 0 : index
    %c0_8 = arith.constant 0 : index
    %39 = vector.load %arg5[%c0_7, %c0_8] : memref<1x128xf32, #tpu.memory_space<vmem>>, vector<1x128xf32>
    %40 = arith.truncf %37 : vector<128x128xf32> to vector<128x128xbf16>
    %cst_9 = arith.constant dense<0.000000e+00> : vector<128x128xf32>
    %41 = tpu.matmul %40, %38, %cst_9 {dimension_numbers = #tpu.dot_dimension_numbers<[1], [0], [0], [1], [0, 0, 1, 1], [], []>} : vector<128x128xbf16>, vector<128x128xbf16>, vector<128x128xf32> -> vector<128x128xf32>
    %42 = vector.broadcast %39 : vector<1x128xf32> to vector<128x128xf32>
    %43 = arith.addf %41, %42 : vector<128x128xf32>
    %cst_10 = arith.constant 0.000000e+00 : f32
    %44 = vector.broadcast %cst_10 : f32 to vector<128x128xf32>
    %45 = arith.subf %44, %43 : vector<128x128xf32>
    %46 = math.exp %45 : vector<128x128xf32>
    %cst_11 = arith.constant 1.000000e+00 : f32
    %47 = vector.broadcast %cst_11 : f32 to vector<128x128xf32>
    %48 = arith.addf %47, %46 : vector<128x128xf32>
    %49 = tpu.reciprocal %48 {approx = true} : vector<128x128xf32> -> vector<128x128xf32>
    %50 = arith.mulf %43, %49 : vector<128x128xf32>
    %c0_12 = arith.constant 0 : index
    %c0_13 = arith.constant 0 : index
    %51 = vector.load %arg6[%c0_12, %c0_13] : memref<128x128xbf16, #tpu.memory_space<vmem>>, vector<128x128xbf16>
    %c0_14 = arith.constant 0 : index
    %c0_15 = arith.constant 0 : index
    %52 = vector.load %arg7[%c0_14, %c0_15] : memref<1x128xf32, #tpu.memory_space<vmem>>, vector<1x128xf32>
    %53 = arith.truncf %50 : vector<128x128xf32> to vector<128x128xbf16>
    %cst_16 = arith.constant dense<0.000000e+00> : vector<128x128xf32>
    %54 = tpu.matmul %53, %51, %cst_16 {dimension_numbers = #tpu.dot_dimension_numbers<[1], [0], [0], [1], [0, 0, 1, 1], [], []>} : vector<128x128xbf16>, vector<128x128xbf16>, vector<128x128xf32> -> vector<128x128xf32>
    %55 = vector.broadcast %52 : vector<1x128xf32> to vector<128x128xf32>
    %56 = arith.addf %54, %55 : vector<128x128xf32>
    %cst_17 = arith.constant 0.000000e+00 : f32
    %57 = vector.broadcast %cst_17 : f32 to vector<128x128xf32>
    %58 = arith.subf %57, %56 : vector<128x128xf32>
    %59 = math.exp %58 : vector<128x128xf32>
    %cst_18 = arith.constant 1.000000e+00 : f32
    %60 = vector.broadcast %cst_18 : f32 to vector<128x128xf32>
    %61 = arith.addf %60, %59 : vector<128x128xf32>
    %62 = tpu.reciprocal %61 {approx = true} : vector<128x128xf32> -> vector<128x128xf32>
    %63 = arith.mulf %56, %62 : vector<128x128xf32>
    %c0_19 = arith.constant 0 : index
    %c0_20 = arith.constant 0 : index
    %64 = vector.load %arg8[%c0_19, %c0_20] : memref<128x128xbf16, #tpu.memory_space<vmem>>, vector<128x128xbf16>
    %c0_21 = arith.constant 0 : index
    %c0_22 = arith.constant 0 : index
    %65 = vector.load %arg9[%c0_21, %c0_22] : memref<1x128xf32, #tpu.memory_space<vmem>>, vector<1x128xf32>
    %66 = arith.truncf %63 : vector<128x128xf32> to vector<128x128xbf16>
    %cst_23 = arith.constant dense<0.000000e+00> : vector<128x128xf32>
    %67 = tpu.matmul %66, %64, %cst_23 {dimension_numbers = #tpu.dot_dimension_numbers<[1], [0], [0], [1], [0, 0, 1, 1], [], []>} : vector<128x128xbf16>, vector<128x128xbf16>, vector<128x128xf32> -> vector<128x128xf32>
    %68 = vector.broadcast %65 : vector<1x128xf32> to vector<128x128xf32>
    %69 = arith.addf %67, %68 : vector<128x128xf32>
    %cst_24 = arith.constant 0.000000e+00 : f32
    %70 = vector.broadcast %cst_24 : f32 to vector<128x128xf32>
    %71 = arith.subf %70, %69 : vector<128x128xf32>
    %72 = math.exp %71 : vector<128x128xf32>
    %cst_25 = arith.constant 1.000000e+00 : f32
    %73 = vector.broadcast %cst_25 : f32 to vector<128x128xf32>
    %74 = arith.addf %73, %72 : vector<128x128xf32>
    %75 = tpu.reciprocal %74 {approx = true} : vector<128x128xf32> -> vector<128x128xf32>
    %76 = arith.mulf %69, %75 : vector<128x128xf32>
    %c0_26 = arith.constant 0 : index
    %c0_27 = arith.constant 0 : index
    %77 = vector.load %arg10[%c0_26, %c0_27] : memref<128x128xbf16, #tpu.memory_space<vmem>>, vector<128x128xbf16>
    %c0_28 = arith.constant 0 : index
    %c0_29 = arith.constant 0 : index
    %78 = vector.load %arg11[%c0_28, %c0_29] : memref<1x128xf32, #tpu.memory_space<vmem>>, vector<1x128xf32>
    %79 = arith.truncf %76 : vector<128x128xf32> to vector<128x128xbf16>
    %cst_30 = arith.constant dense<0.000000e+00> : vector<128x128xf32>
    %80 = tpu.matmul %79, %77, %cst_30 {dimension_numbers = #tpu.dot_dimension_numbers<[1], [0], [0], [1], [0, 0, 1, 1], [], []>} : vector<128x128xbf16>, vector<128x128xbf16>, vector<128x128xf32> -> vector<128x128xf32>
    %81 = vector.broadcast %78 : vector<1x128xf32> to vector<128x128xf32>
    %82 = arith.addf %80, %81 : vector<128x128xf32>
    %cst_31 = arith.constant 0.000000e+00 : f32
    %83 = vector.broadcast %cst_31 : f32 to vector<128x128xf32>
    %84 = arith.subf %83, %82 : vector<128x128xf32>
    %85 = math.exp %84 : vector<128x128xf32>
    %cst_32 = arith.constant 1.000000e+00 : f32
    %86 = vector.broadcast %cst_32 : f32 to vector<128x128xf32>
    %87 = arith.addf %86, %85 : vector<128x128xf32>
    %88 = tpu.reciprocal %87 {approx = true} : vector<128x128xf32> -> vector<128x128xf32>
    %89 = arith.mulf %82, %88 : vector<128x128xf32>
    %c0_33 = arith.constant 0 : index
    %c0_34 = arith.constant 0 : index
    %90 = vector.load %arg12[%c0_33, %c0_34] : memref<128x128xbf16, #tpu.memory_space<vmem>>, vector<128x128xbf16>
    %c0_35 = arith.constant 0 : index
    %c0_36 = arith.constant 0 : index
    %91 = vector.load %arg13[%c0_35, %c0_36] : memref<1x128xf32, #tpu.memory_space<vmem>>, vector<1x128xf32>
    %92 = arith.truncf %89 : vector<128x128xf32> to vector<128x128xbf16>
    %cst_37 = arith.constant dense<0.000000e+00> : vector<128x128xf32>
    %93 = tpu.matmul %92, %90, %cst_37 {dimension_numbers = #tpu.dot_dimension_numbers<[1], [0], [0], [1], [0, 0, 1, 1], [], []>} : vector<128x128xbf16>, vector<128x128xbf16>, vector<128x128xf32> -> vector<128x128xf32>
    %94 = vector.broadcast %91 : vector<1x128xf32> to vector<128x128xf32>
    %95 = arith.addf %93, %94 : vector<128x128xf32>
    %cst_38 = arith.constant 0.000000e+00 : f32
    %96 = vector.broadcast %cst_38 : f32 to vector<128x128xf32>
    %97 = arith.subf %96, %95 : vector<128x128xf32>
    %98 = math.exp %97 : vector<128x128xf32>
    %cst_39 = arith.constant 1.000000e+00 : f32
    %99 = vector.broadcast %cst_39 : f32 to vector<128x128xf32>
    %100 = arith.addf %99, %98 : vector<128x128xf32>
    %101 = tpu.reciprocal %100 {approx = true} : vector<128x128xf32> -> vector<128x128xf32>
    %102 = arith.mulf %95, %101 : vector<128x128xf32>
    %c0_40 = arith.constant 0 : index
    %c0_41 = arith.constant 0 : index
    %103 = vector.load %arg14[%c0_40, %c0_41] : memref<1x128xf32, #tpu.memory_space<vmem>>, vector<1x128xf32>
    %c0_42 = arith.constant 0 : index
    %c0_43 = arith.constant 0 : index
    %104 = vector.load %arg15[%c0_42, %c0_43] : memref<1x1xf32, #tpu.memory_space<vmem>>, vector<1x1xf32>
    %105 = vector.broadcast %103 : vector<1x128xf32> to vector<128x128xf32>
    %106 = arith.mulf %102, %105 : vector<128x128xf32>
    %cst_44 = arith.constant dense<0.000000e+00> : vector<128xf32>
    %107 = vector.multi_reduction <add>, %106, %cst_44 [1] : vector<128x128xf32> to vector<128xf32>
    %108 = vector.shape_cast %107 : vector<128xf32> to vector<128x1xf32>
    %109 = vector.broadcast %104 : vector<1x1xf32> to vector<128x1xf32>
    %110 = arith.addf %108, %109 : vector<128x1xf32>
    %111 = arith.index_cast %1 : i32 to index
    %c0_45 = arith.constant 0 : index
    %112 = vector.load %arg16[%111, %c0_45] : memref<128x1xf32, #tpu.memory_space<vmem>>, vector<128x1xf32>
    tpu.vector_store %arg16[%111, %c0_45], %110 {strides = array<i32>} : memref<128x1xf32, #tpu.memory_space<vmem>>, vector<128x1xf32>,
    %c1_i32 = arith.constant 1 : i32
    return
  }
  func.func @transform_0(%arg0: i32) -> (i32, i32) {
    %c0_i32 = arith.constant 0 : i32
    %c0_i32_0 = arith.constant 0 : i32
    return %arg0, %c0_i32 : i32, i32
  }
  func.func @transform_1(%arg0: i32) -> (i32, i32) {
    %c0_i32 = arith.constant 0 : i32
    %c0_i32_0 = arith.constant 0 : i32
    %c0_i32_1 = arith.constant 0 : i32
    return %c0_i32, %c0_i32_0 : i32, i32
  }
  func.func @transform_2(%arg0: i32) -> (i32, i32) {
    %c0_i32 = arith.constant 0 : i32
    %c0_i32_0 = arith.constant 0 : i32
    %c0_i32_1 = arith.constant 0 : i32
    return %c0_i32, %c0_i32_0 : i32, i32
  }
  func.func @transform_3(%arg0: i32) -> (i32, i32) {
    %c0_i32 = arith.constant 0 : i32
    %c0_i32_0 = arith.constant 0 : i32
    %c0_i32_1 = arith.constant 0 : i32
    return %c0_i32, %c0_i32_0 : i32, i32
  }
  func.func @transform_4(%arg0: i32) -> (i32, i32) {
    %c0_i32 = arith.constant 0 : i32
    %c0_i32_0 = arith.constant 0 : i32
    %c0_i32_1 = arith.constant 0 : i32
    return %c0_i32, %c0_i32_0 : i32, i32
  }
  func.func @transform_5(%arg0: i32) -> (i32, i32) {
    %c0_i32 = arith.constant 0 : i32
    %c0_i32_0 = arith.constant 0 : i32
    %c0_i32_1 = arith.constant 0 : i32
    return %c0_i32, %c0_i32_0 : i32, i32
  }
  func.func @transform_6(%arg0: i32) -> (i32, i32) {
    %c0_i32 = arith.constant 0 : i32
    %c0_i32_0 = arith.constant 0 : i32
    %c0_i32_1 = arith.constant 0 : i32
    return %c0_i32, %c0_i32_0 : i32, i32
  }
  func.func @transform_7(%arg0: i32) -> (i32, i32) {
    %c0_i32 = arith.constant 0 : i32
    %c0_i32_0 = arith.constant 0 : i32
    %c0_i32_1 = arith.constant 0 : i32
    return %c0_i32, %c0_i32_0 : i32, i32
  }
  func.func @transform_8(%arg0: i32) -> (i32, i32) {
    %c0_i32 = arith.constant 0 : i32
    %c0_i32_0 = arith.constant 0 : i32
    %c0_i32_1 = arith.constant 0 : i32
    return %c0_i32, %c0_i32_0 : i32, i32
  }
  func.func @transform_9(%arg0: i32) -> (i32, i32) {
    %c0_i32 = arith.constant 0 : i32
    %c0_i32_0 = arith.constant 0 : i32
    %c0_i32_1 = arith.constant 0 : i32
    return %c0_i32, %c0_i32_0 : i32, i32
  }
  func.func @transform_10(%arg0: i32) -> (i32, i32) {
    %c0_i32 = arith.constant 0 : i32
    %c0_i32_0 = arith.constant 0 : i32
    %c0_i32_1 = arith.constant 0 : i32
    return %c0_i32, %c0_i32_0 : i32, i32
  }
  func.func @transform_11(%arg0: i32) -> (i32, i32) {
    %c0_i32 = arith.constant 0 : i32
    %c0_i32_0 = arith.constant 0 : i32
    %c0_i32_1 = arith.constant 0 : i32
    return %c0_i32, %c0_i32_0 : i32, i32
  }
  func.func @transform_12(%arg0: i32) -> (i32, i32) {
    %c0_i32 = arith.constant 0 : i32
    %c0_i32_0 = arith.constant 0 : i32
    %c0_i32_1 = arith.constant 0 : i32
    return %c0_i32, %c0_i32_0 : i32, i32
  }
  func.func @transform_13(%arg0: i32) -> (i32, i32) {
    %c0_i32 = arith.constant 0 : i32
    %c0_i32_0 = arith.constant 0 : i32
    %c0_i32_1 = arith.constant 0 : i32
    return %c0_i32, %c0_i32_0 : i32, i32
  }
  func.func @transform_14(%arg0: i32) -> (i32, i32) {
    %c0_i32 = arith.constant 0 : i32
    %c0_i32_0 = arith.constant 0 : i32
    %c0_i32_1 = arith.constant 0 : i32
    return %c0_i32, %c0_i32_0 : i32, i32
  }
  func.func @transform_15(%arg0: i32) -> (i32, i32) {
    %c0_i32 = arith.constant 0 : i32
    %c0_i32_0 = arith.constant 0 : i32
    return %arg0, %c0_i32 : i32, i32
  }
}

</mosaic_0001>

<bundles_post_ra>
// kernel: mlp_vector_field.1
= control target key start
LH: loop header
LB: loop body
LE: loop exit
PB: predicated region body
PF: predicated region fallthrough
CT: control target
= control target key end

     0   :  { %v2800_v0 = vmov 0   ;;  %v2801_v6 = vmov 1   ;;  %v2802_v9 = vmov 2   ;;  %v2803_v11 = vmov 3   ;;  %s3553_s0 = inlined_call_operand.vmem [shape: f32[128,4], index: 0, kind: input, shape index: {}]   ;;  %s3554_s3 = inlined_call_operand.vmem [shape: bf16[128,128], index: 3, kind: input, shape index: {}]   ;;  %s3555_s1 = inlined_call_operand.vmem [shape: f32[4,128], index: 1, kind: input, shape index: {}]   ;;  %s3556_s2 = inlined_call_operand.vmem [shape: f32[1,128], index: 2, kind: input, shape index: {}]   ;;  %s3557_s5 = inlined_call_operand.vmem [shape: bf16[128,128], index: 5, kind: input, shape index: {}]   ;;  %s3558_s4 = inlined_call_operand.vmem [shape: f32[1,128], index: 4, kind: input, shape index: {}]   ;;  %s3559_s7 = inlined_call_operand.vmem [shape: bf16[128,128], index: 7, kind: input, shape index: {}]   ;;  %s3560_s6 = inlined_call_operand.vmem [shape: f32[1,128], index: 6, kind: input, shape index: {}]   ;;  %s3561_s9 = inlined_call_operand.vmem [shape: bf16[128,128], index: 9, kind: input, shape index: {}]   ;;  %s3562_s8 = inlined_call_operand.vmem [shape: f32[1,128], index: 8, kind: input, shape index: {}]   ;;  %s3563_s11 = inlined_call_operand.vmem [shape: bf16[128,128], index: 11, kind: input, shape index: {}]   ;;  %s3564_s10 = inlined_call_operand.vmem [shape: f32[1,128], index: 10, kind: input, shape index: {}]   ;;  %s3565_s12 = inlined_call_operand.vmem [shape: f32[1,128], index: 12, kind: input, shape index: {}]   ;;  %s3566_s14 = inlined_call_operand.<no memory space> [shape: f32[1,1], index: 14, kind: input, shape index: {}]   ;;  %s3567_s13 = inlined_call_operand.vmem [shape: f32[1,128], index: 13, kind: input, shape index: {}]   ;;  %s3568_s15 = inlined_call_operand.vmem [shape: f32[128,1], index: 15, kind: output, shape index: {}]  }
   0x1   :  { %2357 = vset.pattern.permute.xlu1 %v2800_v0  ;;  %2356 = vset.pattern.permute.xlu0 %v2800_v0  ;;  %v55_v1 = vld [vmem:[%s3553_s0 + $0x10] sm:$0xff]  ;;  %v53_v2 = vld [vmem:[%s3553_s0] sm:$0xff]  ;;  %v56_v3 = vld [vmem:[%s3553_s0 + $0x18] sm:$0xff]  ;;  %v151_v45 = vlaneseq  ;;  %vm2027_vm0 = vcmask 7168  }
   0x2   :  { %83 = vperm.xlu1 %2357, %v55_v1   ;;  %73 = vperm.xlu0 %2356, %v53_v2   ;;  %v54_v4 = vld [vmem:[%s3553_s0 + $0x8] sm:$0xff]  ;;  %v57_v10 = vld [vmem:[%s3553_s0 + $0x20] sm:$0xff]  ;;  %v60_v12 = vld [vmem:[%s3553_s0 + $0x38] sm:$0xff] }
   0x3   :  { %v58_v5 = vld [vmem:[%s3553_s0 + $0x28] sm:$0xff]  ;;  %v2926_v13 = vld [vmem:[%s3553_s0 + $0x40] sm:$0xff]  ;;  %v2932_v14 = vld [vmem:[%s3553_s0 + $0x58] sm:$0xff]  ;;  %v152_v48 = vshrl.u32 %v151_v45, 7 }
   0x4   :  { %v2905_v7 = vld [vmem:[%s3553_s0 + $0x48] sm:$0xff]  ;;  %v59_v15 = vld [vmem:[%s3553_s0 + $0x30] sm:$0xff]  ;;  %v2942_v16 = vld [vmem:[%s3553_s0 + $0x60] sm:$0xff] }
   0x5   :  { %v2911_v8 = vld [vmem:[%s3553_s0 + $0x68] sm:$0xff]  ;;  %v2948_v17 = vld [vmem:[%s3553_s0 + $0x78] sm:$0xff]  ;;  %v2376_v18 = vld [vmem:[%s3554_s3] sm:$0xff]   ;;  %v153_v51 = vsub.s32 0, %v152_v48  ;;  %v259_v53 = vsub.s32 1, %v152_v48  ;;  %v359_v60 = vsub.s32 2, %v152_v48 }
   0x6   :  { %88 = vperm.xlu1 %2357, %v56_v3   ;;  %78 = vperm.xlu0 %2356, %v54_v4   ;;  %v2377_v19 = vld [vmem:[%s3554_s3 + $0x8] sm:$0xff]   ;;  %v63_v20 = vld [vmem:[%s3553_s0 + $0x50] sm:$0xff]  ;;  %v2379_v22 = vld [vmem:[%s3554_s3 + $0x18] sm:$0xff]  }
   0x7   :  { %2176 = vmatprep.subr.bf16.mxu0 %v2376_v18  ;;  %v2378_v21 = vld [vmem:[%s3554_s3 + $0x10] sm:$0xff]   ;;  %v2380_v23 = vld [vmem:[%s3554_s3 + $0x20] sm:$0xff]   ;;  %v2381_v24 = vld [vmem:[%s3554_s3 + $0x28] sm:$0xff]  }
   0x8   :  { %2177 = vmatpush3.bf16.msra.mxu0 %v2376_v18  ;;  %v2382_v25 = vld [vmem:[%s3554_s3 + $0x30] sm:$0xff]   ;;  %v2383_v26 = vld [vmem:[%s3554_s3 + $0x38] sm:$0xff]   ;;  %v69_v52 = vld [vmem:[%s3555_s1] sm:$0xf] }
   0x9   :  { %2178 = vmatprep.subr.bf16.mxu0 %v2377_v19  ;;  %v67_v29 = vld [vmem:[%s3553_s0 + $0x70] sm:$0xff]  ;;  %v3039_v56 = vrot.slane %v69_v52, %v153_v51  ;;  %v3042_v58 = vrot.slane %v69_v52, %v259_v53  ;;  %v3049_v62 = vld [vmem:[%s3556_s2] ss:$0 sm:$0xff] }
   0xa   :  { %2358 = vset.pattern.permute.xlu1 %v2801_v6  ;;  %98 = vperm.xlu0 %2356, %v58_v5  }
   0xb   :  { %198 = vperm.xlu1 %2358, %v54_v4  }
   0xc   :  { %2179 = vmatpush3.bf16.msra.mxu0 %v2377_v19 }
   0xd   :  { %2180 = vmatprep.subr.bf16.mxu0 %v2378_v21 }
   0xe   :  { %118 = vperm.xlu0 %2356, %v2905_v7  }
   0xf   :  { %202 = vperm.xlu1 %2358, %v55_v1  }
  0x10   :  { %2181 = vmatpush3.bf16.msra.mxu0 %v2378_v21 }
  0x11   :  { %2182 = vmatprep.subr.bf16.mxu0 %v2379_v22 }
  0x12   :  { %138 = vperm.xlu0 %2356, %v2911_v8  }
  0x13   :  { %2359 = vset.pattern.permute.xlu1 %v2802_v9 }
  0x14   :  { %294 = vperm.xlu1 %2359, %v53_v2   ;;  %2183 = vmatpush3.bf16.msra.mxu0 %v2379_v22 }
  0x15   :  { %2184 = vmatprep.subr.bf16.mxu0 %v2380_v23 }
  0x16   :  { %2370 = vset.pattern.permute.xlu0 %v2801_v6 }
  0x17   :  { %194 = vperm.xlu0 %2370, %v53_v2  }
  0x18   :  { %302 = vperm.xlu1 %2359, %v55_v1   ;;  %2185 = vmatpush3.bf16.msra.mxu0 %v2380_v23 }
  0x19   :  { %2186 = vmatprep.subr.bf16.mxu0 %v2381_v24 }
  0x1b   :  { %206 = vperm.xlu0 %2370, %v56_v3  }
  0x1c   :  { %306 = vperm.xlu1 %2359, %v56_v3   ;;  %2187 = vmatpush3.bf16.msra.mxu0 %v2381_v24 }
  0x1d   :  { %2188 = vmatprep.subr.bf16.mxu0 %v2382_v25 }
  0x1f   :  { %210 = vperm.xlu0 %2370, %v57_v10  }
  0x20   :  { %2360 = vset.pattern.permute.xlu1 %v2803_v11  ;;  %2189 = vmatpush3.bf16.msra.mxu0 %v2382_v25 }
  0x21   :  { %398 = vperm.xlu1 %2360, %v54_v4   ;;  %2190 = vmatprep.subr.bf16.mxu0 %v2383_v26 }
  0x23   :  { %222 = vperm.xlu0 %2370, %v60_v12  }
  0x24   :  { %2191 = vmatpush3.bf16.msra.mxu0 %v2383_v26 }
  0x25   :  { %402 = vperm.xlu1 %2360, %v55_v1   ;;  %v459_v1 = vsub.s32 3, %v152_v48 }
  0x27   :  { %226 = vperm.xlu0 %2370, %v2926_v13  }
  0x29   :  { %2361 = vset.pattern.permute.xlu1 %v2800_v0 }
  0x2a   :  { %93 = vperm.xlu1 %2361, %v57_v10  }
  0x2b   :  { %238 = vperm.xlu0 %2370, %v2932_v14  }
  0x2e   :  { %103 = vperm.xlu1 %2361, %v59_v15  }
  0x2f   :  { %242 = vperm.xlu0 %2370, %v2942_v16  }
  0x32   :  { %108 = vperm.xlu1 %2361, %v60_v12  }
  0x33   :  { %254 = vperm.xlu0 %2370, %v2948_v17  }
  0x36   :  { %2362 = vset.pattern.permute.xlu1 %v2801_v6 }
  0x37   :  { %214 = vperm.xlu1 %2362, %v58_v5   ;;  %2372 = vset.pattern.permute.xlu0 %v2802_v9 }
  0x38   :  { %298 = vperm.xlu0 %2372, %v54_v4  }
  0x3b   :  { %218 = vperm.xlu1 %2362, %v59_v15  }
  0x3c   :  { %314 = vperm.xlu0 %2372, %v58_v5  }
  0x3f   :  { %2363 = vset.pattern.permute.xlu1 %v2802_v9 }
  0x40   :  { %310 = vperm.xlu1 %2363, %v57_v10   ;;  %330 = vperm.xlu0 %2372, %v2905_v7  }
  0x44   :  { %318 = vperm.xlu1 %2363, %v59_v15   ;;  %346 = vperm.xlu0 %2372, %v2911_v8  }
  0x48   :  { %322 = vperm.xlu1 %2363, %v60_v12   ;;  %2374 = vset.pattern.permute.xlu0 %v2803_v11 }
  0x49   :  { %394 = vperm.xlu0 %2374, %v53_v2   ;;  %v3053_v2 = vrot.slane %v69_v52, %v359_v60 }
  0x4c   :  { %2364 = vset.pattern.permute.xlu1 %v2803_v11 }
  0x4d   :  { %414 = vperm.xlu1 %2364, %v58_v5   ;;  %406 = vperm.xlu0 %2374, %v56_v3  }
  0x51   :  { %418 = vperm.xlu1 %2364, %v59_v15   ;;  %410 = vperm.xlu0 %2374, %v57_v10  }
  0x55   :  { %2365 = vset.pattern.permute.xlu1 %v2800_v0  ;;  %422 = vperm.xlu0 %2374, %v60_v12  }
  0x56   :  { %113 = vperm.xlu1 %2365, %v2926_v13  }
  0x59   :  { %426 = vperm.xlu0 %2374, %v2926_v13  }
  0x5a   :  { %123 = vperm.xlu1 %2365, %v63_v20  }
  0x5d   :  { %438 = vperm.xlu0 %2374, %v2932_v14  }
  0x5e   :  { %128 = vperm.xlu1 %2365, %v2932_v14  }
  0x61   :  { %442 = vperm.xlu0 %2374, %v2942_v16  }
  0x62   :  { %2366 = vset.pattern.permute.xlu1 %v2801_v6 }
  0x63   :  { %230 = vperm.xlu1 %2366, %v2905_v7  }
  0x65   :  { %454 = vperm.xlu0 %2374, %v2948_v17  }
  0x67   :  { %234 = vperm.xlu1 %2366, %v63_v20  }
  0x6b   :  { %2367 = vset.pattern.permute.xlu1 %v2802_v9 }
  0x6c   :  { %326 = vperm.xlu1 %2367, %v2926_v13  }
  0x70   :  { %334 = vperm.xlu1 %2367, %v63_v20  }
  0x74   :  { %338 = vperm.xlu1 %2367, %v2932_v14  }
  0x78   :  { %2368 = vset.pattern.permute.xlu1 %v2803_v11 }
  0x79   :  { %430 = vperm.xlu1 %2368, %v2905_v7   ;;  %v3056_v7 = vrot.slane %v69_v52, %v459_v1 }
  0x7d   :  { %434 = vperm.xlu1 %2368, %v63_v20  }
  0x81   :  { %v84_v27 = vpop.permute.xlu1 %83  ;;  %2369 = vset.pattern.permute.xlu1 %v2800_v0  ;;  %v3000_v28 = vpop.permute.xlu0 %73 }
  0x82   :  { %133 = vperm.xlu1 %2369, %v2942_v16   ;;  %v155_v13 = vmul.f32 %v3039_v56, %v3000_v28 }
  0x84   :  { %v177_v23 = vadd.f32 %v3049_v62, %v155_v13 }
  0x85   :  { %v3006_v30 = vpop.permute.xlu1 %88  ;;  %v79_v31 = vpop.permute.xlu0 %78 }
  0x86   :  { %143 = vperm.xlu1 %2369, %v67_v29   ;;  %v156_v57 = vmul.f32 %v3039_v56, %v79_v31  ;;  %v158_v20 = vmul.f32 %v3039_v56, %v3006_v30 }
  0x88   :  { %v178_v63 = vadd.f32 %v3049_v62, %v156_v57  ;;  %v180_v30 = vadd.f32 %v3049_v62, %v158_v20 }
  0x89   :  { %v3008_v32 = vpop.permute.xlu0 %98 }
  0x8a   :  { %v199_v33 = vpop.permute.xlu1 %198  ;;  %148 = vperm.xlu1 %2369, %v2948_v17  }
  0x8b   :  { %v262_v0 = vmul.f32 %v3042_v58, %v199_v33 }
  0x8d   :  { %v3011_v34 = vpop.permute.xlu0 %118 }
  0x8e   :  { %v203_v35 = vpop.permute.xlu1 %202  ;;  %2371 = vset.pattern.permute.xlu1 %v2801_v6  ;;  %v278_v6 = vadd.f32 %v262_v0, %v178_v63 }
  0x8f   :  { %246 = vperm.xlu1 %2371, %v2911_v8   ;;  %v263_v12 = vmul.f32 %v3042_v58, %v203_v35 }
  0x91   :  { %v3015_v36 = vpop.permute.xlu0 %138 }
  0x93   :  { %250 = vperm.xlu1 %2371, %v67_v29   ;;  %v3017_v37 = vpop.permute.xlu1 %294 }
  0x96   :  { %v195_v38 = vpop.permute.xlu0 %194 }
  0x97   :  { %2373 = vset.pattern.permute.xlu1 %v2802_v9  ;;  %v303_v39 = vpop.permute.xlu1 %302  ;;  %v261_v24 = vmul.f32 %v3042_v58, %v195_v38 }
  0x98   :  { %342 = vperm.xlu1 %2373, %v2942_v16   ;;  %v363_v16 = vmul.f32 %v3053_v2, %v303_v39 }
  0x99   :  { %v277_v35 = vadd.f32 %v261_v24, %v177_v23 }
  0x9a   :  { %v207_v40 = vpop.permute.xlu0 %206 }
  0x9b   :  { %v3021_v41 = vpop.permute.xlu1 %306  ;;  %v264_v26 = vmul.f32 %v3042_v58, %v207_v40  ;;  %v361_v40 = vmul.f32 %v3053_v2, %v3017_v37 }
  0x9c   :  { %350 = vperm.xlu1 %2373, %v67_v29   ;;  %v364_v38 = vmul.f32 %v3053_v2, %v3021_v41 }
  0x9d   :  { %v280_v39 = vadd.f32 %v264_v26, %v180_v30  ;;  %v377_v60 = vadd.f32 %v361_v40, %v277_v35 }
  0x9e   :  { %v3023_v42 = vpop.permute.xlu0 %210 }
  0x9f   :  { %v380_v63 = vadd.f32 %v364_v38, %v280_v39  ;;  %v265_v37 = vmul.f32 %v3042_v58, %v3023_v42 }
  0xa0   :  { %354 = vperm.xlu1 %2373, %v2948_v17   ;;  %v399_v43 = vpop.permute.xlu1 %398 }
  0xa1   :  { %v462_v14 = vmul.f32 %v3056_v7, %v399_v43 }
  0xa2   :  { %v3026_v44 = vpop.permute.xlu0 %222 }
  0xa4   :  { %2375 = vset.pattern.permute.xlu1 %v2803_v11  ;;  %v403_v46 = vpop.permute.xlu1 %402 }
  0xa5   :  { %446 = vperm.xlu1 %2375, %v2911_v8   ;;  %v157_v8 = vmul.f32 %v3039_v56, %v84_v27  ;;  %v463_v22 = vmul.f32 %v3056_v7, %v403_v46  ;;  %v160_v27 = vmul.f32 %v3039_v56, %v3008_v32 }
  0xa6   :  { %v3030_v47 = vpop.permute.xlu0 %226 }
  0xa7   :  { %v179_v15 = vadd.f32 %v3049_v62, %v157_v8  ;;  %v182_v43 = vadd.f32 %v3049_v62, %v160_v27 }
  0xa9   :  { %450 = vperm.xlu1 %2375, %v67_v29   ;;  %v94_v49 = vpop.permute.xlu1 %93  ;;  %v279_v21 = vadd.f32 %v263_v12, %v179_v15  ;;  %v268_v12 = vmul.f32 %v3042_v58, %v3026_v44 }
  0xaa   :  { %v3032_v50 = vpop.permute.xlu0 %238  ;;  %v159_v51 = vmul.f32 %v3039_v56, %v94_v49 }
  0xab   :  { %v379_v25 = vadd.f32 %v363_v16, %v279_v21 }
  0xad   :  { %v104_v54 = vpop.permute.xlu1 %103  ;;  %v3081_v33 = vadd.f32 %v463_v22, %v379_v25 }
  0xae   :  { %v3037_v55 = vpop.permute.xlu0 %242  ;;  %v161_v52 = vmul.f32 %v3039_v56, %v104_v54  ;;  %v181_v54 = vadd.f32 %v3049_v62, %v159_v51 }
  0xaf   :  { %v495_v48 = vsub.f32 0.0, %v3081_v33 }
  0xb0   :  { %v281_v22 = vadd.f32 %v265_v37, %v181_v54 }
  0xb1   :  { %v109_v59 = vpop.permute.xlu1 %108  ;;  %v513_v49 = vmul.f32 1.442695, %v495_v48 }
  0xb2   :  { %v3044_v61 = vpop.permute.xlu0 %254  ;;  %v162_v1 = vmul.f32 %v3039_v56, %v109_v59 }
  0xb4   :  { %v184_v15 = vadd.f32 %v3049_v62, %v162_v1 }
  0xb6   :  { %v215_v3 = vpop.permute.xlu1 %214  ;;  %v284_v30 = vadd.f32 %v268_v12, %v184_v15 }
  0xb7   :  { %v299_v4 = vpop.permute.xlu0 %298  ;;  %v266_v32 = vmul.f32 %v3042_v58, %v215_v3 }
  0xb8   :  { %v362_v5 = vmul.f32 %v3053_v2, %v299_v4 }
  0xb9   :  { %v282_v3 = vadd.f32 %v266_v32, %v182_v43 }
  0xba   :  { %v219_v9 = vpop.permute.xlu1 %218  ;;  %v378_v10 = vadd.f32 %v362_v5, %v278_v6  ;;  %v183_v5 = vadd.f32 %v3049_v62, %v161_v52 }
  0xbb   :  { %v315_v11 = vpop.permute.xlu0 %314  ;;  %v267_v0 = vmul.f32 %v3042_v58, %v219_v9 }
  0xbc   :  { %v3067_v19 = vadd.f32 %v462_v14, %v378_v10  ;;  %v366_v57 = vmul.f32 %v3053_v2, %v315_v11 }
  0xbd   :  { %v283_v13 = vadd.f32 %v267_v0, %v183_v5 }
  0xbe   :  { %v494_v31 = vsub.f32 0.0, %v3067_v19  ;;  %v382_v11 = vadd.f32 %v366_v57, %v282_v3 }
  0xbf   :  { %v311_v17 = vpop.permute.xlu1 %310  ;;  %v3065_v18 = vpop.permute.xlu0 %330 }
  0xc0   :  { %v511_v46 = vmul.f32 1.442695, %v494_v31  ;;  %v365_v14 = vmul.f32 %v3053_v2, %v311_v17 }
  0xc2   :  { %2416 = vpow2.f32 %v511_v46 }
  0xc3   :  { %v319_v28 = vpop.permute.xlu1 %318  ;;  %v3077_v29 = vpop.permute.xlu0 %346  ;;  %2418 = vpow2.f32 %v513_v49 }
  0xc4   :  { %v367_v6 = vmul.f32 %v3053_v2, %v319_v28  ;;  %v381_v28 = vadd.f32 %v365_v14, %v281_v22 }
  0xc6   :  { %v383_v23 = vadd.f32 %v367_v6, %v283_v13 }
  0xc7   :  { %v323_v45 = vpop.permute.xlu1 %322 }
  0xc8   :  { %v395_v53 = vpop.permute.xlu0 %394  ;;  %v368_v24 = vmul.f32 %v3053_v2, %v323_v45 }
  0xc9   :  { %v461_v41 = vmul.f32 %v3056_v7, %v395_v53 }
  0xca   :  { %v384_v45 = vadd.f32 %v368_v24, %v284_v30  ;;  %v269_v24 = vmul.f32 %v3042_v58, %v3030_v47 }
  0xcb   :  { %v3098_v4 = vadd.f32 %v461_v41, %v377_v60 }
  0xcc   :  { %v415_v8 = vpop.permute.xlu1 %414  ;;  %v407_v10 = vpop.permute.xlu0 %406 }
  0xcd   :  { %v493_v42 = vsub.f32 0.0, %v3098_v4  ;;  %v466_v9 = vmul.f32 %v3056_v7, %v415_v8  ;;  %v464_v59 = vmul.f32 %v3056_v7, %v407_v10  ;;  %v2417_v32 = vpop.eup %2416 }
  0xce   :  { %v542_v41 = vadd.f32 1.0, %v2417_v32  ;;  %v2419_v0 = vpop.eup %2418 }
  0xcf   :  { %v509_v16 = vmul.f32 1.442695, %v493_v42  ;;  %v3110_v20 = vadd.f32 %v466_v9, %v382_v11  ;;  %v3112_v21 = vadd.f32 %v464_v59, %v380_v63  ;;  %v543_v54 = vadd.f32 1.0, %v2419_v0 }
  0xd0   :  { %v419_v25 = vpop.permute.xlu1 %418  ;;  %v411_v26 = vpop.permute.xlu0 %410 }
  0xd1   :  { %2420 = vpow2.f32 %v509_v16  ;;  %v498_v44 = vsub.f32 0.0, %v3110_v20  ;;  %v496_v27 = vsub.f32 0.0, %v3112_v21  ;;  %v467_v17 = vmul.f32 %v3056_v7, %v419_v25 }
  0xd2   :  { %v465_v31 = vmul.f32 %v3056_v7, %v411_v26 }
  0xd3   :  { %v519_v35 = vmul.f32 1.442695, %v498_v44  ;;  %v515_v39 = vmul.f32 1.442695, %v496_v27  ;;  %v3119_v38 = vadd.f32 %v467_v17, %v383_v23 }
  0xd4   :  { %v3121_v43 = vadd.f32 %v465_v31, %v381_v28  ;;  %v423_v40 = vpop.permute.xlu0 %422 }
  0xd5   :  { %2422 = vpow2.f32 %v519_v35  ;;  %v499_v46 = vsub.f32 0.0, %v3119_v38  ;;  %v468_v48 = vmul.f32 %v3056_v7, %v423_v40  ;;  %v114_v51 = vpop.permute.xlu1 %113 }
  0xd6   :  { %2424 = vpow2.f32 %v515_v39  ;;  %v497_v52 = vsub.f32 0.0, %v3121_v43  ;;  %v163_v13 = vmul.f32 %v3039_v56, %v114_v51 }
  0xd7   :  { %v521_v53 = vmul.f32 1.442695, %v499_v46  ;;  %v3126_v57 = vadd.f32 %v468_v48, %v384_v45  ;;  %v164_v48 = vmul.f32 %v3039_v56, %v3011_v34 }
  0xd8   :  { %v517_v60 = vmul.f32 1.442695, %v497_v52  ;;  %v185_v26 = vadd.f32 %v3049_v62, %v163_v13  ;;  %v427_v17 = vpop.permute.xlu0 %426 }
  0xd9   :  { %2426 = vpow2.f32 %v521_v53  ;;  %v500_v63 = vsub.f32 0.0, %v3126_v57  ;;  %v3129_v37 = vpop.permute.xlu1 %123  ;;  %v469_v47 = vmul.f32 %v3056_v7, %v427_v17  ;;  %v186_v34 = vadd.f32 %v3049_v62, %v164_v48 }
  0xda   :  { %2428 = vpow2.f32 %v517_v60  ;;  %v285_v39 = vadd.f32 %v269_v24, %v185_v26 }
  0xdb   :  { %v2421_v1 = vpop.eup %2420  ;;  %v523_v3 = vmul.f32 1.442695, %v500_v63  ;;  %2430 = vrcp.f32 %v542_v41 }
  0xdc   :  { %v541_v49 = vadd.f32 1.0, %v2421_v1  ;;  %v439_v0 = vpop.permute.xlu0 %438 }
  0xdd   :  { %2432 = vpow2.f32 %v523_v3  ;;  %v129_v5 = vpop.permute.xlu1 %128 }
  0xde   :  { %2434 = vrcp.f32 %v541_v49  ;;  %v166_v35 = vmul.f32 %v3039_v56, %v129_v5  ;;  %v370_v49 = vmul.f32 %v3053_v2, %v3065_v18 }
  0xdf   :  { %v2423_v6 = vpop.eup %2422  ;;  %2436 = vrcp.f32 %v543_v54 }
  0xe0   :  { %v2425_v8 = vpop.eup %2424  ;;  %v546_v10 = vadd.f32 1.0, %v2423_v6  ;;  %v188_v52 = vadd.f32 %v3049_v62, %v166_v35 }
  0xe1   :  { %v544_v11 = vadd.f32 1.0, %v2425_v8 }
  0xe2   :  { %v231_v42 = vpop.permute.xlu1 %230 }
  0xe3   :  { %v2427_v9 = vpop.eup %2426  ;;  %2438 = vrcp.f32 %v544_v11  ;;  %v270_v63 = vmul.f32 %v3042_v58, %v231_v42  ;;  %v165_v42 = vmul.f32 %v3039_v56, %v3129_v37 }
  0xe4   :  { %v2429_v59 = vpop.eup %2428  ;;  %v547_v12 = vadd.f32 1.0, %v2427_v9  ;;  %2440 = vrcp.f32 %v546_v10 }
  0xe5   :  { %v545_v14 = vadd.f32 1.0, %v2429_v59  ;;  %v2431_v15 = vpop.eup %2430  ;;  %v286_v9 = vadd.f32 %v270_v63, %v186_v34 }
  0xe6   :  { %v235_v16 = vpop.permute.xlu1 %234  ;;  %v574_v27 = vmul.f32 %v2431_v15, %v3067_v19 }
  0xe7   :  { %v2433_v22 = vpop.eup %2432  ;;  %2442 = vrcp.f32 %v545_v14  ;;  %v271_v18 = vmul.f32 %v3042_v58, %v235_v16 }
  0xe8   :  { %v2435_v23 = vpop.eup %2434  ;;  %2444 = vrcp.f32 %v547_v12  ;;  %v548_v25 = vadd.f32 1.0, %v2433_v22  ;;  %v187_v22 = vadd.f32 %v3049_v62, %v165_v42 }
  0xe9   :  { %v573_v44 = vmul.f32 %v2435_v23, %v3098_v4  ;;  %v2437_v28 = vpop.eup %2436 }
  0xea   :  { %2446 = vrcp.f32 %v548_v25  ;;  %v575_v45 = vmul.f32 %v2437_v28, %v3081_v33  ;;  %v272_v33 = vmul.f32 %v3042_v58, %v3032_v50  ;;  %v472_v50 = vmul.f32 %v3056_v7, %v439_v0 }
  0xeb   :  { %v327_v31 = vpop.permute.xlu1 %326  ;;  %v606_v30 = vpack.c.bf16 %v574_v27, %v573_v44  ;;  %v287_v37 = vadd.f32 %v271_v18, %v187_v22 }
  0xec   :  { %v369_v40 = vmul.f32 %v3053_v2, %v327_v31  ;;  %v288_v8 = vadd.f32 %v272_v33, %v188_v52  ;;  %v374_v33 = vmul.f32 %v3053_v2, %v3077_v29 }
  0xed   :  { %v2439_v32 = vpop.eup %2438  ;;  %2192 = vmatprep.mubr.bf16.mxu0 %v606_v30 }
  0xee   :  { %v576_v4 = vmul.f32 %v2439_v32, %v3112_v21  ;;  %v385_v46 = vadd.f32 %v369_v40, %v285_v39  ;;  %v2441_v19 = vpop.eup %2440 }
  0xef   :  { %v335_v51 = vpop.permute.xlu1 %334  ;;  %v578_v21 = vmul.f32 %v2441_v19, %v3110_v20  ;;  %v168_v19 = vmul.f32 %v3039_v56, %v3015_v36 }
  0xf0   :  { %v3145_v53 = vadd.f32 %v469_v47, %v385_v46  ;;  %v607_v60 = vpack.c.bf16 %v576_v4, %v575_v45  ;;  %v371_v23 = vmul.f32 %v3053_v2, %v335_v51 }
  0xf1   :  { %v2443_v41 = vpop.eup %2442 }
  0xf2   :  { %v2445_v1 = vpop.eup %2444  ;;  %v577_v3 = vmul.f32 %v2443_v41, %v3121_v43  ;;  %2193 = vmatmul.mubr.bf16.vlgmr.msra.gmra.mrb[0].mxu0 %v607_v60  ;;  %v501_v54 = vsub.f32 0.0, %v3145_v53  ;;  %v387_v44 = vadd.f32 %v371_v23, %v287_v37  ;;  %v190_v41 = vadd.f32 %v3049_v62, %v168_v19 }
  0xf3   :  { %v339_v5 = vpop.permute.xlu1 %338  ;;  %v579_v20 = vmul.f32 %v2445_v1, %v3119_v38  ;;  %v386_v38 = vadd.f32 %v370_v49, %v286_v9  ;;  %v276_v23 = vmul.f32 %v3042_v58, %v3044_v61 }
  0xf4   :  { %v2447_v6 = vpop.eup %2446  ;;  %v372_v10 = vmul.f32 %v3053_v2, %v339_v5  ;;  %v608_v11 = vpack.c.bf16 %v578_v21, %v577_v3  ;;  %v525_v12 = vmul.f32 1.442695, %v501_v54  ;;  %v273_v54 = vmul.f32 %v3042_v58, %v3037_v55 }
  0xf5   :  { %v580_v43 = vmul.f32 %v2447_v6, %v3126_v57 }
  0xf6   :  { %v388_v59 = vadd.f32 %v372_v10, %v288_v8  ;;  %2196 = vmatprep.mubr.bf16.mxu0 %v608_v11  ;;  %2448 = vpow2.f32 %v525_v12 }
  0xf7   :  { %v609_v13 = vpack.c.bf16 %v580_v43, %v579_v20  ;;  %v443_v20 = vpop.permute.xlu0 %442 }
  0xf8   :  { %v3163_v14 = vadd.f32 %v472_v50, %v388_v59  ;;  %v431_v15 = vpop.permute.xlu1 %430  ;;  %v473_v42 = vmul.f32 %v3056_v7, %v443_v20  ;;  %v2390_v20 = vld [vmem:[%s3557_s5 + $0x30] sm:$0xff]  }
  0xf9   :  { %v470_v57 = vmul.f32 %v3056_v7, %v431_v15 }
  0xfa   :  { %v504_v24 = vsub.f32 0.0, %v3163_v14  ;;  %2197 = vmatmul.mubr.bf16.gmra.mrb[4].mxu0 %v609_v13 }
  0xfb   :  { %v486_v25 = vadd.f32 %v470_v57, %v386_v38 }
  0xfc   :  { %v531_v26 = vmul.f32 1.442695, %v504_v24  ;;  %v435_v16 = vpop.permute.xlu1 %434 }
  0xfd   :  { %v502_v27 = vsub.f32 0.0, %v486_v25  ;;  %v471_v17 = vmul.f32 %v3056_v7, %v435_v16 }
  0xfe   :  { %2450 = vpow2.f32 %v531_v26 }
  0xff   :  { %v527_v28 = vmul.f32 1.442695, %v502_v27  ;;  %v487_v31 = vadd.f32 %v471_v17, %v387_v44 }
 0x100   :  { %v2449_v40 = vpop.eup %2448 }
 0x101   :  { %2452 = vpow2.f32 %v527_v28  ;;  %v503_v30 = vsub.f32 0.0, %v487_v31  ;;  %v134_v35 = vpop.permute.xlu1 %133  ;;  %v549_v32 = vadd.f32 1.0, %v2449_v40 }
 0x102   :  { %v167_v1 = vmul.f32 %v3039_v56, %v134_v35 }
 0x103   :  { %v529_v39 = vmul.f32 1.442695, %v503_v30 }
 0x104   :  { %v189_v34 = vadd.f32 %v3049_v62, %v167_v1 }
 0x105   :  { %2454 = vpow2.f32 %v529_v39  ;;  %v144_v47 = vpop.permute.xlu1 %143 }
 0x106   :  { %2456 = vrcp.f32 %v549_v32  ;;  %v289_v10 = vadd.f32 %v273_v54, %v189_v34  ;;  %v169_v26 = vmul.f32 %v3039_v56, %v144_v47 }
 0x108   :  { %v2451_v45 = vpop.eup %2450  ;;  %v191_v61 = vadd.f32 %v3049_v62, %v169_v26 }
 0x109   :  { %v149_v4 = vpop.permute.xlu1 %148  ;;  %v552_v48 = vadd.f32 1.0, %v2451_v45 }
 0x10a   :  { %v170_v8 = vmul.f32 %v3039_v56, %v149_v4 }
 0x10b   :  { %v2453_v46 = vpop.eup %2452 }
 0x10c   :  { %v550_v51 = vadd.f32 1.0, %v2453_v46  ;;  %v192_v55 = vadd.f32 %v3049_v62, %v170_v8  ;;  %v2385_v8 = vld [vmem:[%s3557_s5 + $0x8] sm:$0xff]  }
 0x10e   :  { %2458 = vrcp.f32 %v550_v51  ;;  %v247_v52 = vpop.permute.xlu1 %246  ;;  %v292_v37 = vadd.f32 %v276_v23, %v192_v55 }
 0x10f   :  { %v2455_v60 = vpop.eup %2454  ;;  %v274_v63 = vmul.f32 %v3042_v58, %v247_v52  ;;  %2460 = vrcp.f32 %v552_v48 }
 0x110   :  { %v551_v0 = vadd.f32 1.0, %v2455_v60  ;;  %v2457_v49 = vpop.eup %2456 }
 0x111   :  { %v290_v21 = vadd.f32 %v274_v63, %v190_v41  ;;  %v581_v50 = vmul.f32 %v2457_v49, %v3145_v53  ;;  %v455_v53 = vpop.permute.xlu0 %454 }
 0x112   :  { %2462 = vrcp.f32 %v551_v0  ;;  %v251_v36 = vpop.permute.xlu1 %250  ;;  %v476_v16 = vmul.f32 %v3056_v7, %v455_v53 }
 0x113   :  { %v390_v3 = vadd.f32 %v374_v33, %v290_v21 }
 0x117   :  { %v343_v5 = vpop.permute.xlu1 %342 }
 0x118   :  { %v2459_v6 = vpop.eup %2458  ;;  %v373_v11 = vmul.f32 %v3053_v2, %v343_v5  ;;  %v2384_v5 = vld [vmem:[%s3557_s5] sm:$0xff]  }
 0x119   :  { %v582_v29 = vmul.f32 %v2459_v6, %v486_v25  ;;  %v2461_v43 = vpop.eup %2460  ;;  %2208 = vmatprep.subr.bf16.mxu1 %v2384_v5 }
 0x11a   :  { %v389_v9 = vadd.f32 %v373_v11, %v289_v10  ;;  %v584_v15 = vmul.f32 %v2461_v43, %v3163_v14  ;;  %v275_v14 = vmul.f32 %v3042_v58, %v251_v36  ;;  %2209 = vmatpush3.bf16.msra.mxu1 %v2384_v5  ;;  %v2386_v10 = vld [vmem:[%s3557_s5 + $0x10] sm:$0xff]   ;;  %v2387_v11 = vld [vmem:[%s3557_s5 + $0x18] sm:$0xff]  }
 0x11b   :  { %v351_v59 = vpop.permute.xlu1 %350  ;;  %v610_v18 = vpack.c.bf16 %v582_v29, %v581_v50  ;;  %2210 = vmatprep.subr.bf16.mxu1 %v2385_v8  ;;  %v2388_v50 = vld [vmem:[%s3557_s5 + $0x20] sm:$0xff]   ;;  %v2389_v29 = vld [vmem:[%s3557_s5 + $0x28] sm:$0xff]   ;;  %v2391_v43 = vld [vmem:[%s3557_s5 + $0x38] sm:$0xff]  }
 0x11c   :  { %v2463_v12 = vpop.eup %2462  ;;  %v489_v13 = vadd.f32 %v473_v42, %v389_v9  ;;  %v291_v39 = vadd.f32 %v275_v14, %v191_v61  ;;  %v3223_v42 = vld [vmem:[%s3558_s4] ss:$0 sm:$0xff] }
 0x11d   :  { %v583_v22 = vmul.f32 %v2463_v12, %v487_v31  ;;  %2200 = vmatprep.mubr.bf16.mxu0 %v610_v18  ;;  %v375_v31 = vmul.f32 %v3053_v2, %v351_v59 }
 0x11e   :  { %v505_v38 = vsub.f32 0.0, %v489_v13  ;;  %2211 = vmatpush3.bf16.msra.mxu1 %v2385_v8 }
 0x11f   :  { %v355_v57 = vpop.permute.xlu1 %354  ;;  %v611_v24 = vpack.c.bf16 %v584_v15, %v583_v22  ;;  %v391_v32 = vadd.f32 %v375_v31, %v291_v39  ;;  %2212 = vmatprep.subr.bf16.mxu1 %v2386_v10 }
 0x120   :  { %v376_v25 = vmul.f32 %v3053_v2, %v355_v57  ;;  %v533_v27 = vmul.f32 1.442695, %v505_v38 }
 0x121   :  { %2201 = vmatmul.mubr.bf16.gmra.mrb[8].mxu0 %v611_v24 }
 0x122   :  { %v392_v44 = vadd.f32 %v376_v25, %v292_v37  ;;  %2464 = vpow2.f32 %v533_v27  ;;  %2213 = vmatpush3.bf16.msra.mxu1 %v2386_v10 }
 0x123   :  { %2214 = vmatprep.subr.bf16.mxu1 %v2387_v11 }
 0x124   :  { %v492_v17 = vadd.f32 %v476_v16, %v392_v44  ;;  %v447_v28 = vpop.permute.xlu1 %446 }
 0x125   :  { %v474_v30 = vmul.f32 %v3056_v7, %v447_v28 }
 0x126   :  { %v508_v35 = vsub.f32 0.0, %v492_v17  ;;  %2215 = vmatpush3.bf16.msra.mxu1 %v2387_v11 }
 0x127   :  { %v490_v40 = vadd.f32 %v474_v30, %v390_v3  ;;  %2216 = vmatprep.subr.bf16.mxu1 %v2388_v50 }
 0x128   :  { %v539_v56 = vmul.f32 1.442695, %v508_v35  ;;  %v451_v47 = vpop.permute.xlu1 %450 }
 0x129   :  { %v506_v45 = vsub.f32 0.0, %v490_v40  ;;  %v475_v4 = vmul.f32 %v3056_v7, %v451_v47 }
 0x12a   :  { %2466 = vpow2.f32 %v539_v56  ;;  %2217 = vmatpush3.bf16.msra.mxu1 %v2388_v50 }
 0x12b   :  { %v535_v58 = vmul.f32 1.442695, %v506_v45  ;;  %v491_v46 = vadd.f32 %v475_v4, %v391_v32  ;;  %2218 = vmatprep.subr.bf16.mxu1 %v2389_v29 }
 0x12c   :  { %v2465_v48 = vpop.eup %2464 }
 0x12d   :  { %2468 = vpow2.f32 %v535_v58  ;;  %v507_v19 = vsub.f32 0.0, %v491_v46  ;;  %v553_v2 = vadd.f32 1.0, %v2465_v48 }
 0x12e   :  { %2219 = vmatpush3.bf16.msra.mxu1 %v2389_v29 }
 0x12f   :  { %v537_v62 = vmul.f32 1.442695, %v507_v19  ;;  %2220 = vmatprep.subr.bf16.mxu1 %v2390_v20 }
 0x131   :  { %2470 = vpow2.f32 %v537_v62 }
 0x132   :  { %2472 = vrcp.f32 %v553_v2  ;;  %2221 = vmatpush3.bf16.msra.mxu1 %v2390_v20 }
 0x133   :  { %2222 = vmatprep.subr.bf16.mxu1 %v2391_v43 }
 0x134   :  { %v2467_v51 = vpop.eup %2466 }
 0x135   :  { %v556_v60 = vadd.f32 1.0, %v2467_v51 }
 0x136   :  { %2223 = vmatpush3.bf16.msra.mxu1 %v2391_v43 }
 0x137   :  { %v2469_v52 = vpop.eup %2468 }
 0x138   :  { %v554_v41 = vadd.f32 1.0, %v2469_v52 }
 0x13a   :  { %2474 = vrcp.f32 %v554_v41 }
 0x13b   :  { %v2471_v63 = vpop.eup %2470  ;;  %2476 = vrcp.f32 %v556_v60 }
 0x13c   :  { %v555_v0 = vadd.f32 1.0, %v2471_v63  ;;  %v2473_v7 = vpop.eup %2472 }
 0x13d   :  { %v585_v21 = vmul.f32 %v2473_v7, %v489_v13 }
 0x13e   :  { %2478 = vrcp.f32 %v555_v0 }
 0x144   :  { %v2475_v1 = vpop.eup %2474 }
 0x145   :  { %v586_v33 = vmul.f32 %v2475_v1, %v490_v40  ;;  %v2477_v36 = vpop.eup %2476 }
 0x146   :  { %v588_v54 = vmul.f32 %v2477_v36, %v492_v17 }
 0x147   :  { %v612_v3 = vpack.c.bf16 %v586_v33, %v585_v21 }
 0x148   :  { %v2479_v34 = vpop.eup %2478 }
 0x149   :  { %v587_v49 = vmul.f32 %v2479_v34, %v491_v46  ;;  %2204 = vmatprep.mubr.bf16.mxu0 %v612_v3 }
 0x14b   :  { %v613_v6 = vpack.c.bf16 %v588_v54, %v587_v49 }
 0x14d   :  { %2205 = vmatmul.mubr.bf16.gmra.mrb[12].mxu0 %v613_v6 }
 0x1c5   :  { %v2194_v9 = vpop.f32.mrb[0].mxu0 }
 0x1c6   :  { %v3226_v59 = vadd.f32 %v2194_v9, %v3223_v42  ;;  %v702_v18 = vpop.f32.mrb[1].mxu0 }
 0x1c7   :  { %v3229_v12 = vadd.f32 %v3223_v42, %v702_v18  ;;  %v2195_v55 = vpop.f32.mrb[2].mxu0 }
 0x1c8   :  { %v767_v13 = vsub.f32 0.0, %v3226_v59  ;;  %v3233_v15 = vadd.f32 %v2195_v55, %v3223_v42  ;;  %v705_v22 = vpop.f32.mrb[3].mxu0 }
 0x1c9   :  { %v765_v23 = vsub.f32 0.0, %v3229_v12  ;;  %v706_v53 = vadd.f32 %v3223_v42, %v705_v22 }
 0x1ca   :  { %v785_v38 = vmul.f32 1.442695, %v767_v13  ;;  %v768_v57 = vsub.f32 0.0, %v3233_v15 }
 0x1cb   :  { %v781_v24 = vmul.f32 1.442695, %v765_v23  ;;  %v766_v37 = vsub.f32 0.0, %v706_v53 }
 0x1cc   :  { %2480 = vpow2.f32 %v785_v38  ;;  %v787_v25 = vmul.f32 1.442695, %v768_v57 }
 0x1cd   :  { %2482 = vpow2.f32 %v781_v24  ;;  %v783_v26 = vmul.f32 1.442695, %v766_v37  ;;  %v2198_v16 = vpop.f32.mrb[4].mxu0 }
 0x1ce   :  { %2484 = vpow2.f32 %v787_v25  ;;  %v727_v44 = vadd.f32 %v2198_v16, %v3223_v42  ;;  %v718_v14 = vpop.f32.mrb[5].mxu0 }
 0x1cf   :  { %2486 = vpow2.f32 %v783_v26  ;;  %v719_v27 = vadd.f32 %v3223_v42, %v718_v14  ;;  %v2199_v17 = vpop.f32.mrb[6].mxu0 }
 0x1d0   :  { %v771_v28 = vsub.f32 0.0, %v727_v44  ;;  %v730_v61 = vadd.f32 %v2199_v17, %v3223_v42  ;;  %v721_v31 = vpop.f32.mrb[7].mxu0 }
 0x1d1   :  { %v769_v30 = vsub.f32 0.0, %v719_v27  ;;  %v722_v35 = vadd.f32 %v3223_v42, %v721_v31 }
 0x1d2   :  { %v793_v39 = vmul.f32 1.442695, %v771_v28  ;;  %v772_v40 = vsub.f32 0.0, %v730_v61 }
 0x1d3   :  { %v789_v56 = vmul.f32 1.442695, %v769_v30  ;;  %v770_v47 = vsub.f32 0.0, %v722_v35 }
 0x1d4   :  { %2488 = vpow2.f32 %v793_v39  ;;  %v795_v32 = vmul.f32 1.442695, %v772_v40 }
 0x1d5   :  { %2490 = vpow2.f32 %v789_v56  ;;  %v791_v45 = vmul.f32 1.442695, %v770_v47 }
 0x1d6   :  { %v2481_v4 = vpop.eup %2480  ;;  %2492 = vpow2.f32 %v795_v32 }
 0x1d7   :  { %v2483_v58 = vpop.eup %2482  ;;  %v815_v46 = vadd.f32 1.0, %v2481_v4  ;;  %2494 = vpow2.f32 %v791_v45 }
 0x1d8   :  { %v2485_v19 = vpop.eup %2484  ;;  %v813_v62 = vadd.f32 1.0, %v2483_v58 }
 0x1d9   :  { %v2487_v48 = vpop.eup %2486  ;;  %2496 = vrcp.f32 %v815_v46  ;;  %v816_v2 = vadd.f32 1.0, %v2485_v19 }
 0x1da   :  { %2498 = vrcp.f32 %v813_v62  ;;  %v814_v51 = vadd.f32 1.0, %v2487_v48 }
 0x1db   :  { %2500 = vrcp.f32 %v816_v2 }
 0x1dc   :  { %2502 = vrcp.f32 %v814_v51 }
 0x1de   :  { %v2489_v52 = vpop.eup %2488 }
 0x1df   :  { %v2491_v60 = vpop.eup %2490  ;;  %v819_v41 = vadd.f32 1.0, %v2489_v52 }
 0x1e0   :  { %v2493_v63 = vpop.eup %2492  ;;  %v817_v0 = vadd.f32 1.0, %v2491_v60 }
 0x1e1   :  { %v2495_v7 = vpop.eup %2494  ;;  %2504 = vrcp.f32 %v819_v41  ;;  %v820_v1 = vadd.f32 1.0, %v2493_v63 }
 0x1e2   :  { %2506 = vrcp.f32 %v817_v0  ;;  %v818_v33 = vadd.f32 1.0, %v2495_v7 }
 0x1e3   :  { %v2497_v21 = vpop.eup %2496  ;;  %2508 = vrcp.f32 %v820_v1 }
 0x1e4   :  { %v2499_v36 = vpop.eup %2498  ;;  %2510 = vrcp.f32 %v818_v33  ;;  %v847_v49 = vmul.f32 %v2497_v21, %v3226_v59 }
 0x1e5   :  { %v2501_v3 = vpop.eup %2500  ;;  %v845_v5 = vmul.f32 %v2499_v36, %v3229_v12 }
 0x1e6   :  { %v2503_v34 = vpop.eup %2502  ;;  %v848_v54 = vmul.f32 %v2501_v3, %v3233_v15 }
 0x1e7   :  { %v846_v6 = vmul.f32 %v2503_v34, %v706_v53 }
 0x1e8   :  { %v879_v8 = vpack.c.bf16 %v848_v54, %v847_v49 }
 0x1e9   :  { %v878_v10 = vpack.c.bf16 %v846_v6, %v845_v5 }
 0x1eb   :  { %v2505_v11 = vpop.eup %2504  ;;  %2224 = vmatprep.mubr.bf16.mxu1 %v878_v10 }
 0x1ec   :  { %v2507_v50 = vpop.eup %2506  ;;  %2225 = vmatmul.mubr.bf16.vlgmr.msra.gmra.mrb[0].mxu1 %v879_v8  ;;  %v851_v43 = vmul.f32 %v2505_v11, %v727_v44 }
 0x1ed   :  { %v2509_v29 = vpop.eup %2508  ;;  %v849_v18 = vmul.f32 %v2507_v50, %v719_v27 }
 0x1ee   :  { %v2511_v20 = vpop.eup %2510  ;;  %v852_v9 = vmul.f32 %v2509_v29, %v730_v61 }
 0x1ef   :  { %v850_v55 = vmul.f32 %v2511_v20, %v722_v35 }
 0x1f0   :  { %v881_v13 = vpack.c.bf16 %v852_v9, %v851_v43 }
 0x1f1   :  { %v880_v22 = vpack.c.bf16 %v850_v55, %v849_v18 }
 0x1f3   :  { %2228 = vmatprep.mubr.bf16.mxu1 %v880_v22 }
 0x1f4   :  { %2229 = vmatmul.mubr.bf16.gmra.mrb[4].mxu1 %v881_v13  ;;  %v2202_v59 = vpop.f32.mrb[8].mxu0 }
 0x1f5   :  { %v743_v12 = vadd.f32 %v2202_v59, %v3223_v42  ;;  %v734_v15 = vpop.f32.mrb[9].mxu0 }
 0x1f6   :  { %v735_v23 = vadd.f32 %v3223_v42, %v734_v15  ;;  %v2203_v53 = vpop.f32.mrb[10].mxu0 }
 0x1f7   :  { %v775_v38 = vsub.f32 0.0, %v743_v12  ;;  %v746_v57 = vadd.f32 %v2203_v53, %v3223_v42  ;;  %v737_v24 = vpop.f32.mrb[11].mxu0  ;;  %v2392_v53 = vld [vmem:[%s3559_s7] sm:$0xff]  }
 0x1f8   :  { %v773_v37 = vsub.f32 0.0, %v735_v23  ;;  %v738_v25 = vadd.f32 %v3223_v42, %v737_v24  ;;  %2240 = vmatprep.subr.bf16.mxu0 %v2392_v53  ;;  %v2395_v24 = vld [vmem:[%s3559_s7 + $0x18] sm:$0xff]  }
 0x1f9   :  { %v801_v26 = vmul.f32 1.442695, %v775_v38  ;;  %v776_v16 = vsub.f32 0.0, %v746_v57  ;;  %2241 = vmatpush3.bf16.msra.mxu0 %v2392_v53  ;;  %v2393_v38 = vld [vmem:[%s3559_s7 + $0x8] sm:$0xff]  }
 0x1fa   :  { %v797_v44 = vmul.f32 1.442695, %v773_v37  ;;  %v774_v14 = vsub.f32 0.0, %v738_v25  ;;  %2242 = vmatprep.subr.bf16.mxu0 %v2393_v38  ;;  %v2396_v37 = vld [vmem:[%s3559_s7 + $0x20] sm:$0xff]  }
 0x1fb   :  { %2512 = vpow2.f32 %v801_v26  ;;  %v803_v27 = vmul.f32 1.442695, %v776_v16  ;;  %v2398_v26 = vld [vmem:[%s3559_s7 + $0x30] sm:$0xff]   ;;  %v2399_v16 = vld [vmem:[%s3559_s7 + $0x38] sm:$0xff]  }
 0x1fc   :  { %2514 = vpow2.f32 %v797_v44  ;;  %v799_v17 = vmul.f32 1.442695, %v774_v14  ;;  %v3280_v44 = vld [vmem:[%s3560_s6] ss:$0 sm:$0xff] }
 0x1fd   :  { %2516 = vpow2.f32 %v803_v27  ;;  %2243 = vmatpush3.bf16.msra.mxu0 %v2393_v38 }
 0x1fe   :  { %2518 = vpow2.f32 %v799_v17 }
 0x205   :  { %v2513_v28 = vpop.eup %2512 }
 0x206   :  { %v2515_v61 = vpop.eup %2514  ;;  %v823_v31 = vadd.f32 1.0, %v2513_v28 }
 0x207   :  { %v2517_v30 = vpop.eup %2516  ;;  %v821_v35 = vadd.f32 1.0, %v2515_v61 }
 0x208   :  { %v2519_v39 = vpop.eup %2518  ;;  %2520 = vrcp.f32 %v823_v31  ;;  %v824_v40 = vadd.f32 1.0, %v2517_v30 }
 0x209   :  { %2522 = vrcp.f32 %v821_v35  ;;  %v822_v56 = vadd.f32 1.0, %v2519_v39 }
 0x20a   :  { %2524 = vrcp.f32 %v824_v40 }
 0x20b   :  { %2526 = vrcp.f32 %v822_v56 }
 0x212   :  { %v2521_v47 = vpop.eup %2520 }
 0x213   :  { %v2523_v32 = vpop.eup %2522  ;;  %v855_v58 = vmul.f32 %v2521_v47, %v743_v12 }
 0x214   :  { %v2525_v45 = vpop.eup %2524  ;;  %v853_v19 = vmul.f32 %v2523_v32, %v735_v23 }
 0x215   :  { %v2527_v4 = vpop.eup %2526  ;;  %v856_v46 = vmul.f32 %v2525_v45, %v746_v57  ;;  %v2394_v57 = vld [vmem:[%s3559_s7 + $0x10] sm:$0xff]  }
 0x216   :  { %v854_v62 = vmul.f32 %v2527_v4, %v738_v25  ;;  %2244 = vmatprep.subr.bf16.mxu0 %v2394_v57  ;;  %v2397_v25 = vld [vmem:[%s3559_s7 + $0x28] sm:$0xff]  }
 0x217   :  { %v883_v48 = vpack.c.bf16 %v856_v46, %v855_v58  ;;  %2245 = vmatpush3.bf16.msra.mxu0 %v2394_v57 }
 0x218   :  { %v882_v2 = vpack.c.bf16 %v854_v62, %v853_v19  ;;  %2246 = vmatprep.subr.bf16.mxu0 %v2395_v24 }
 0x21a   :  { %2232 = vmatprep.mubr.bf16.mxu1 %v882_v2 }
 0x21b   :  { %2233 = vmatmul.mubr.bf16.gmra.mrb[8].mxu1 %v883_v48  ;;  %2247 = vmatpush3.bf16.msra.mxu0 %v2395_v24 }
 0x21c   :  { %2248 = vmatprep.subr.bf16.mxu0 %v2396_v37 }
 0x21f   :  { %2249 = vmatpush3.bf16.msra.mxu0 %v2396_v37 }
 0x220   :  { %v2206_v51 = vpop.f32.mrb[12].mxu0  ;;  %2250 = vmatprep.subr.bf16.mxu0 %v2397_v25 }
 0x221   :  { %v759_v52 = vadd.f32 %v2206_v51, %v3223_v42  ;;  %v750_v60 = vpop.f32.mrb[13].mxu0 }
 0x222   :  { %v751_v41 = vadd.f32 %v3223_v42, %v750_v60  ;;  %v2207_v63 = vpop.f32.mrb[14].mxu0 }
 0x223   :  { %v779_v0 = vsub.f32 0.0, %v759_v52  ;;  %v762_v7 = vadd.f32 %v2207_v63, %v3223_v42  ;;  %v753_v1 = vpop.f32.mrb[15].mxu0  ;;  %2251 = vmatpush3.bf16.msra.mxu0 %v2397_v25 }
 0x224   :  { %v777_v33 = vsub.f32 0.0, %v751_v41  ;;  %v754_v21 = vadd.f32 %v3223_v42, %v753_v1  ;;  %2252 = vmatprep.subr.bf16.mxu0 %v2398_v26 }
 0x225   :  { %v809_v36 = vmul.f32 1.442695, %v779_v0  ;;  %v780_v3 = vsub.f32 0.0, %v762_v7 }
 0x226   :  { %v805_v34 = vmul.f32 1.442695, %v777_v33  ;;  %v778_v49 = vsub.f32 0.0, %v754_v21 }
 0x227   :  { %2528 = vpow2.f32 %v809_v36  ;;  %v811_v54 = vmul.f32 1.442695, %v780_v3  ;;  %2253 = vmatpush3.bf16.msra.mxu0 %v2398_v26 }
 0x228   :  { %2530 = vpow2.f32 %v805_v34  ;;  %v807_v5 = vmul.f32 1.442695, %v778_v49  ;;  %2254 = vmatprep.subr.bf16.mxu0 %v2399_v16 }
 0x229   :  { %2532 = vpow2.f32 %v811_v54 }
 0x22a   :  { %2534 = vpow2.f32 %v807_v5 }
 0x22b   :  { %2255 = vmatpush3.bf16.msra.mxu0 %v2399_v16 }
 0x231   :  { %v2529_v6 = vpop.eup %2528 }
 0x232   :  { %v2531_v8 = vpop.eup %2530  ;;  %v827_v10 = vadd.f32 1.0, %v2529_v6 }
 0x233   :  { %v2533_v11 = vpop.eup %2532  ;;  %v825_v50 = vadd.f32 1.0, %v2531_v8 }
 0x234   :  { %v2535_v29 = vpop.eup %2534  ;;  %2536 = vrcp.f32 %v827_v10  ;;  %v828_v20 = vadd.f32 1.0, %v2533_v11 }
 0x235   :  { %2538 = vrcp.f32 %v825_v50  ;;  %v826_v42 = vadd.f32 1.0, %v2535_v29 }
 0x236   :  { %2540 = vrcp.f32 %v828_v20 }
 0x237   :  { %2542 = vrcp.f32 %v826_v42 }
 0x23e   :  { %v2537_v43 = vpop.eup %2536 }
 0x23f   :  { %v2539_v9 = vpop.eup %2538  ;;  %v859_v13 = vmul.f32 %v2537_v43, %v759_v52 }
 0x240   :  { %v2541_v18 = vpop.eup %2540  ;;  %v857_v59 = vmul.f32 %v2539_v9, %v751_v41 }
 0x241   :  { %v2543_v55 = vpop.eup %2542  ;;  %v860_v22 = vmul.f32 %v2541_v18, %v762_v7 }
 0x242   :  { %v858_v12 = vmul.f32 %v2543_v55, %v754_v21 }
 0x243   :  { %v885_v15 = vpack.c.bf16 %v860_v22, %v859_v13 }
 0x244   :  { %v884_v23 = vpack.c.bf16 %v858_v12, %v857_v59 }
 0x246   :  { %2236 = vmatprep.mubr.bf16.mxu1 %v884_v23 }
 0x247   :  { %2237 = vmatmul.mubr.bf16.gmra.mrb[12].mxu1 %v885_v15 }
 0x2bf   :  { %v2226_v14 = vpop.f32.mrb[0].mxu1 }
 0x2c0   :  { %v3283_v27 = vadd.f32 %v2226_v14, %v3280_v44  ;;  %v974_v17 = vpop.f32.mrb[1].mxu1 }
 0x2c1   :  { %v3286_v28 = vadd.f32 %v3280_v44, %v974_v17  ;;  %v2227_v61 = vpop.f32.mrb[2].mxu1 }
 0x2c2   :  { %v1039_v31 = vsub.f32 0.0, %v3283_v27  ;;  %v3290_v30 = vadd.f32 %v2227_v61, %v3280_v44  ;;  %v977_v35 = vpop.f32.mrb[3].mxu1 }
 0x2c3   :  { %v1037_v39 = vsub.f32 0.0, %v3286_v28  ;;  %v978_v40 = vadd.f32 %v3280_v44, %v977_v35 }
 0x2c4   :  { %v1057_v56 = vmul.f32 1.442695, %v1039_v31  ;;  %v1040_v47 = vsub.f32 0.0, %v3290_v30 }
 0x2c5   :  { %v1053_v32 = vmul.f32 1.442695, %v1037_v39  ;;  %v1038_v45 = vsub.f32 0.0, %v978_v40 }
 0x2c6   :  { %2544 = vpow2.f32 %v1057_v56  ;;  %v1059_v4 = vmul.f32 1.442695, %v1040_v47 }
 0x2c7   :  { %2546 = vpow2.f32 %v1053_v32  ;;  %v1055_v58 = vmul.f32 1.442695, %v1038_v45  ;;  %v2230_v46 = vpop.f32.mrb[4].mxu1 }
 0x2c8   :  { %2548 = vpow2.f32 %v1059_v4  ;;  %v999_v19 = vadd.f32 %v2230_v46, %v3280_v44  ;;  %v990_v62 = vpop.f32.mrb[5].mxu1 }
 0x2c9   :  { %2550 = vpow2.f32 %v1055_v58  ;;  %v991_v48 = vadd.f32 %v3280_v44, %v990_v62  ;;  %v2231_v2 = vpop.f32.mrb[6].mxu1 }
 0x2ca   :  { %v1043_v51 = vsub.f32 0.0, %v999_v19  ;;  %v1002_v52 = vadd.f32 %v2231_v2, %v3280_v44  ;;  %v993_v60 = vpop.f32.mrb[7].mxu1 }
 0x2cb   :  { %v1041_v41 = vsub.f32 0.0, %v991_v48  ;;  %v994_v63 = vadd.f32 %v3280_v44, %v993_v60 }
 0x2cc   :  { %v1065_v0 = vmul.f32 1.442695, %v1043_v51  ;;  %v1044_v7 = vsub.f32 0.0, %v1002_v52 }
 0x2cd   :  { %v1061_v1 = vmul.f32 1.442695, %v1041_v41  ;;  %v1042_v33 = vsub.f32 0.0, %v994_v63 }
 0x2ce   :  { %2552 = vpow2.f32 %v1065_v0  ;;  %v1067_v21 = vmul.f32 1.442695, %v1044_v7 }
 0x2cf   :  { %2554 = vpow2.f32 %v1061_v1  ;;  %v1063_v36 = vmul.f32 1.442695, %v1042_v33 }
 0x2d0   :  { %v2545_v3 = vpop.eup %2544  ;;  %2556 = vpow2.f32 %v1067_v21 }
 0x2d1   :  { %v2547_v34 = vpop.eup %2546  ;;  %v1087_v49 = vadd.f32 1.0, %v2545_v3  ;;  %2558 = vpow2.f32 %v1063_v36 }
 0x2d2   :  { %v2549_v54 = vpop.eup %2548  ;;  %v1085_v5 = vadd.f32 1.0, %v2547_v34 }
 0x2d3   :  { %v2551_v6 = vpop.eup %2550  ;;  %2560 = vrcp.f32 %v1087_v49  ;;  %v1088_v8 = vadd.f32 1.0, %v2549_v54 }
 0x2d4   :  { %2562 = vrcp.f32 %v1085_v5  ;;  %v1086_v10 = vadd.f32 1.0, %v2551_v6 }
 0x2d5   :  { %2564 = vrcp.f32 %v1088_v8 }
 0x2d6   :  { %2566 = vrcp.f32 %v1086_v10 }
 0x2d8   :  { %v2553_v11 = vpop.eup %2552 }
 0x2d9   :  { %v2555_v50 = vpop.eup %2554  ;;  %v1091_v29 = vadd.f32 1.0, %v2553_v11 }
 0x2da   :  { %v2557_v20 = vpop.eup %2556  ;;  %v1089_v42 = vadd.f32 1.0, %v2555_v50 }
 0x2db   :  { %v2559_v43 = vpop.eup %2558  ;;  %2568 = vrcp.f32 %v1091_v29  ;;  %v1092_v9 = vadd.f32 1.0, %v2557_v20 }
 0x2dc   :  { %2570 = vrcp.f32 %v1089_v42  ;;  %v1090_v18 = vadd.f32 1.0, %v2559_v43 }
 0x2dd   :  { %v2561_v55 = vpop.eup %2560  ;;  %2572 = vrcp.f32 %v1092_v9 }
 0x2de   :  { %v2563_v13 = vpop.eup %2562  ;;  %2574 = vrcp.f32 %v1090_v18  ;;  %v1119_v12 = vmul.f32 %v2561_v55, %v3283_v27 }
 0x2df   :  { %v2565_v22 = vpop.eup %2564  ;;  %v1117_v23 = vmul.f32 %v2563_v13, %v3286_v28 }
 0x2e0   :  { %v2567_v59 = vpop.eup %2566  ;;  %v1120_v15 = vmul.f32 %v2565_v22, %v3290_v30 }
 0x2e1   :  { %v1118_v53 = vmul.f32 %v2567_v59, %v978_v40 }
 0x2e2   :  { %v1151_v38 = vpack.c.bf16 %v1120_v15, %v1119_v12 }
 0x2e3   :  { %v1150_v57 = vpack.c.bf16 %v1118_v53, %v1117_v23 }
 0x2e5   :  { %v2569_v24 = vpop.eup %2568  ;;  %2256 = vmatprep.mubr.bf16.mxu0 %v1150_v57 }
 0x2e6   :  { %v2571_v37 = vpop.eup %2570  ;;  %2257 = vmatmul.mubr.bf16.vlgmr.msra.gmra.mrb[16].mxu0 %v1151_v38  ;;  %v1123_v16 = vmul.f32 %v2569_v24, %v999_v19 }
 0x2e7   :  { %v2573_v25 = vpop.eup %2572  ;;  %v1121_v17 = vmul.f32 %v2571_v37, %v991_v48 }
 0x2e8   :  { %v2575_v26 = vpop.eup %2574  ;;  %v1124_v14 = vmul.f32 %v2573_v25, %v1002_v52 }
 0x2e9   :  { %v1122_v61 = vmul.f32 %v2575_v26, %v994_v63 }
 0x2ea   :  { %v1153_v31 = vpack.c.bf16 %v1124_v14, %v1123_v16 }
 0x2eb   :  { %v1152_v35 = vpack.c.bf16 %v1122_v61, %v1121_v17 }
 0x2ed   :  { %2260 = vmatprep.mubr.bf16.mxu0 %v1152_v35 }
 0x2ee   :  { %2261 = vmatmul.mubr.bf16.gmra.mrb[20].mxu0 %v1153_v31  ;;  %v2234_v27 = vpop.f32.mrb[8].mxu1 }
 0x2ef   :  { %v1015_v28 = vadd.f32 %v2234_v27, %v3280_v44  ;;  %v1006_v30 = vpop.f32.mrb[9].mxu1 }
 0x2f0   :  { %v1007_v39 = vadd.f32 %v3280_v44, %v1006_v30  ;;  %v2235_v40 = vpop.f32.mrb[10].mxu1 }
 0x2f1   :  { %v1047_v56 = vsub.f32 0.0, %v1015_v28  ;;  %v1018_v47 = vadd.f32 %v2235_v40, %v3280_v44  ;;  %v1009_v32 = vpop.f32.mrb[11].mxu1  ;;  %v2400_v40 = vld [vmem:[%s3561_s9] sm:$0xff]  }
 0x2f2   :  { %v1045_v45 = vsub.f32 0.0, %v1007_v39  ;;  %v1010_v4 = vadd.f32 %v3280_v44, %v1009_v32  ;;  %2272 = vmatprep.subr.bf16.mxu1 %v2400_v40  ;;  %v2403_v32 = vld [vmem:[%s3561_s9 + $0x18] sm:$0xff]  }
 0x2f3   :  { %v1073_v58 = vmul.f32 1.442695, %v1047_v56  ;;  %v1048_v46 = vsub.f32 0.0, %v1018_v47  ;;  %2273 = vmatpush3.bf16.msra.mxu1 %v2400_v40  ;;  %v2401_v56 = vld [vmem:[%s3561_s9 + $0x8] sm:$0xff]  }
 0x2f4   :  { %v1069_v19 = vmul.f32 1.442695, %v1045_v45  ;;  %v1046_v62 = vsub.f32 0.0, %v1010_v4  ;;  %2274 = vmatprep.subr.bf16.mxu1 %v2401_v56  ;;  %v2404_v45 = vld [vmem:[%s3561_s9 + $0x20] sm:$0xff]  }
 0x2f5   :  { %2576 = vpow2.f32 %v1073_v58  ;;  %v1075_v48 = vmul.f32 1.442695, %v1048_v46  ;;  %v2406_v58 = vld [vmem:[%s3561_s9 + $0x30] sm:$0xff]   ;;  %v2407_v46 = vld [vmem:[%s3561_s9 + $0x38] sm:$0xff]  }
 0x2f6   :  { %2578 = vpow2.f32 %v1069_v19  ;;  %v1071_v2 = vmul.f32 1.442695, %v1046_v62  ;;  %v3337_v19 = vld [vmem:[%s3562_s8] ss:$0 sm:$0xff] }
 0x2f7   :  { %2580 = vpow2.f32 %v1075_v48  ;;  %2275 = vmatpush3.bf16.msra.mxu1 %v2401_v56 }
 0x2f8   :  { %2582 = vpow2.f32 %v1071_v2 }
 0x2ff   :  { %v2577_v51 = vpop.eup %2576 }
 0x300   :  { %v2579_v52 = vpop.eup %2578  ;;  %v1095_v60 = vadd.f32 1.0, %v2577_v51 }
 0x301   :  { %v2581_v41 = vpop.eup %2580  ;;  %v1093_v63 = vadd.f32 1.0, %v2579_v52 }
 0x302   :  { %v2583_v0 = vpop.eup %2582  ;;  %2584 = vrcp.f32 %v1095_v60  ;;  %v1096_v7 = vadd.f32 1.0, %v2581_v41 }
 0x303   :  { %2586 = vrcp.f32 %v1093_v63  ;;  %v1094_v1 = vadd.f32 1.0, %v2583_v0 }
 0x304   :  { %2588 = vrcp.f32 %v1096_v7 }
 0x305   :  { %2590 = vrcp.f32 %v1094_v1 }
 0x30c   :  { %v2585_v33 = vpop.eup %2584 }
 0x30d   :  { %v2587_v21 = vpop.eup %2586  ;;  %v1127_v34 = vmul.f32 %v2585_v33, %v1015_v28 }
 0x30e   :  { %v2589_v36 = vpop.eup %2588  ;;  %v1125_v54 = vmul.f32 %v2587_v21, %v1007_v39 }
 0x30f   :  { %v2591_v3 = vpop.eup %2590  ;;  %v1128_v49 = vmul.f32 %v2589_v36, %v1018_v47  ;;  %v2402_v47 = vld [vmem:[%s3561_s9 + $0x10] sm:$0xff]  }
 0x310   :  { %v1126_v5 = vmul.f32 %v2591_v3, %v1010_v4  ;;  %2276 = vmatprep.subr.bf16.mxu1 %v2402_v47  ;;  %v2405_v4 = vld [vmem:[%s3561_s9 + $0x28] sm:$0xff]  }
 0x311   :  { %v1155_v6 = vpack.c.bf16 %v1128_v49, %v1127_v34  ;;  %2277 = vmatpush3.bf16.msra.mxu1 %v2402_v47 }
 0x312   :  { %v1154_v8 = vpack.c.bf16 %v1126_v5, %v1125_v54  ;;  %2278 = vmatprep.subr.bf16.mxu1 %v2403_v32 }
 0x314   :  { %2264 = vmatprep.mubr.bf16.mxu0 %v1154_v8 }
 0x315   :  { %2265 = vmatmul.mubr.bf16.gmra.mrb[24].mxu0 %v1155_v6  ;;  %2279 = vmatpush3.bf16.msra.mxu1 %v2403_v32 }
 0x316   :  { %2280 = vmatprep.subr.bf16.mxu1 %v2404_v45 }
 0x319   :  { %2281 = vmatpush3.bf16.msra.mxu1 %v2404_v45 }
 0x31a   :  { %v2238_v10 = vpop.f32.mrb[12].mxu1  ;;  %2282 = vmatprep.subr.bf16.mxu1 %v2405_v4 }
 0x31b   :  { %v1031_v11 = vadd.f32 %v2238_v10, %v3280_v44  ;;  %v1022_v50 = vpop.f32.mrb[13].mxu1 }
 0x31c   :  { %v1023_v29 = vadd.f32 %v3280_v44, %v1022_v50  ;;  %v2239_v20 = vpop.f32.mrb[14].mxu1 }
 0x31d   :  { %v1051_v42 = vsub.f32 0.0, %v1031_v11  ;;  %v1034_v43 = vadd.f32 %v2239_v20, %v3280_v44  ;;  %v1025_v9 = vpop.f32.mrb[15].mxu1  ;;  %2283 = vmatpush3.bf16.msra.mxu1 %v2405_v4 }
 0x31e   :  { %v1049_v18 = vsub.f32 0.0, %v1023_v29  ;;  %v1026_v55 = vadd.f32 %v3280_v44, %v1025_v9  ;;  %2284 = vmatprep.subr.bf16.mxu1 %v2406_v58 }
 0x31f   :  { %v1081_v13 = vmul.f32 1.442695, %v1051_v42  ;;  %v1052_v22 = vsub.f32 0.0, %v1034_v43 }
 0x320   :  { %v1077_v59 = vmul.f32 1.442695, %v1049_v18  ;;  %v1050_v12 = vsub.f32 0.0, %v1026_v55 }
 0x321   :  { %2592 = vpow2.f32 %v1081_v13  ;;  %v1083_v15 = vmul.f32 1.442695, %v1052_v22  ;;  %2285 = vmatpush3.bf16.msra.mxu1 %v2406_v58 }
 0x322   :  { %2594 = vpow2.f32 %v1077_v59  ;;  %v1079_v23 = vmul.f32 1.442695, %v1050_v12  ;;  %2286 = vmatprep.subr.bf16.mxu1 %v2407_v46 }
 0x323   :  { %2596 = vpow2.f32 %v1083_v15 }
 0x324   :  { %2598 = vpow2.f32 %v1079_v23 }
 0x325   :  { %2287 = vmatpush3.bf16.msra.mxu1 %v2407_v46 }
 0x32b   :  { %v2593_v53 = vpop.eup %2592 }
 0x32c   :  { %v2595_v38 = vpop.eup %2594  ;;  %v1099_v57 = vadd.f32 1.0, %v2593_v53 }
 0x32d   :  { %v2597_v24 = vpop.eup %2596  ;;  %v1097_v37 = vadd.f32 1.0, %v2595_v38 }
 0x32e   :  { %v2599_v25 = vpop.eup %2598  ;;  %2600 = vrcp.f32 %v1099_v57  ;;  %v1100_v26 = vadd.f32 1.0, %v2597_v24 }
 0x32f   :  { %2602 = vrcp.f32 %v1097_v37  ;;  %v1098_v44 = vadd.f32 1.0, %v2599_v25 }
 0x330   :  { %2604 = vrcp.f32 %v1100_v26 }
 0x331   :  { %2606 = vrcp.f32 %v1098_v44 }
 0x338   :  { %v2601_v16 = vpop.eup %2600 }
 0x339   :  { %v2603_v14 = vpop.eup %2602  ;;  %v1131_v31 = vmul.f32 %v2601_v16, %v1031_v11 }
 0x33a   :  { %v2605_v17 = vpop.eup %2604  ;;  %v1129_v27 = vmul.f32 %v2603_v14, %v1023_v29 }
 0x33b   :  { %v2607_v61 = vpop.eup %2606  ;;  %v1132_v35 = vmul.f32 %v2605_v17, %v1034_v43 }
 0x33c   :  { %v1130_v28 = vmul.f32 %v2607_v61, %v1026_v55 }
 0x33d   :  { %v1157_v30 = vpack.c.bf16 %v1132_v35, %v1131_v31 }
 0x33e   :  { %v1156_v39 = vpack.c.bf16 %v1130_v28, %v1129_v27 }
 0x340   :  { %2268 = vmatprep.mubr.bf16.mxu0 %v1156_v39 }
 0x341   :  { %2269 = vmatmul.mubr.bf16.gmra.mrb[28].mxu0 %v1157_v30 }
 0x3b9   :  { %v2258_v62 = vpop.f32.mrb[16].mxu0 }
 0x3ba   :  { %v3340_v48 = vadd.f32 %v2258_v62, %v3337_v19  ;;  %v1246_v2 = vpop.f32.mrb[17].mxu0 }
 0x3bb   :  { %v3343_v51 = vadd.f32 %v3337_v19, %v1246_v2  ;;  %v2259_v52 = vpop.f32.mrb[18].mxu0 }
 0x3bc   :  { %v1311_v60 = vsub.f32 0.0, %v3340_v48  ;;  %v3347_v41 = vadd.f32 %v2259_v52, %v3337_v19  ;;  %v1249_v63 = vpop.f32.mrb[19].mxu0 }
 0x3bd   :  { %v1309_v0 = vsub.f32 0.0, %v3343_v51  ;;  %v1250_v7 = vadd.f32 %v3337_v19, %v1249_v63 }
 0x3be   :  { %v1329_v1 = vmul.f32 1.442695, %v1311_v60  ;;  %v1312_v33 = vsub.f32 0.0, %v3347_v41 }
 0x3bf   :  { %v1325_v21 = vmul.f32 1.442695, %v1309_v0  ;;  %v1310_v36 = vsub.f32 0.0, %v1250_v7 }
 0x3c0   :  { %2608 = vpow2.f32 %v1329_v1  ;;  %v1331_v3 = vmul.f32 1.442695, %v1312_v33 }
 0x3c1   :  { %2610 = vpow2.f32 %v1325_v21  ;;  %v1327_v34 = vmul.f32 1.442695, %v1310_v36  ;;  %v2262_v49 = vpop.f32.mrb[20].mxu0 }
 0x3c2   :  { %2612 = vpow2.f32 %v1331_v3  ;;  %v1271_v54 = vadd.f32 %v2262_v49, %v3337_v19  ;;  %v1262_v5 = vpop.f32.mrb[21].mxu0 }
 0x3c3   :  { %2614 = vpow2.f32 %v1327_v34  ;;  %v1263_v6 = vadd.f32 %v3337_v19, %v1262_v5  ;;  %v2263_v8 = vpop.f32.mrb[22].mxu0 }
 0x3c4   :  { %v1315_v10 = vsub.f32 0.0, %v1271_v54  ;;  %v1274_v11 = vadd.f32 %v2263_v8, %v3337_v19  ;;  %v1265_v50 = vpop.f32.mrb[23].mxu0 }
 0x3c5   :  { %v1313_v29 = vsub.f32 0.0, %v1263_v6  ;;  %v1266_v20 = vadd.f32 %v3337_v19, %v1265_v50 }
 0x3c6   :  { %v1337_v42 = vmul.f32 1.442695, %v1315_v10  ;;  %v1316_v43 = vsub.f32 0.0, %v1274_v11 }
 0x3c7   :  { %v1333_v9 = vmul.f32 1.442695, %v1313_v29  ;;  %v1314_v18 = vsub.f32 0.0, %v1266_v20 }
 0x3c8   :  { %2616 = vpow2.f32 %v1337_v42  ;;  %v1339_v55 = vmul.f32 1.442695, %v1316_v43 }
 0x3c9   :  { %2618 = vpow2.f32 %v1333_v9  ;;  %v1335_v13 = vmul.f32 1.442695, %v1314_v18 }
 0x3ca   :  { %v2609_v22 = vpop.eup %2608  ;;  %2620 = vpow2.f32 %v1339_v55 }
 0x3cb   :  { %v2611_v59 = vpop.eup %2610  ;;  %v1359_v12 = vadd.f32 1.0, %v2609_v22  ;;  %2622 = vpow2.f32 %v1335_v13 }
 0x3cc   :  { %v2613_v15 = vpop.eup %2612  ;;  %v1357_v23 = vadd.f32 1.0, %v2611_v59 }
 0x3cd   :  { %v2615_v53 = vpop.eup %2614  ;;  %2624 = vrcp.f32 %v1359_v12  ;;  %v1360_v38 = vadd.f32 1.0, %v2613_v15 }
 0x3ce   :  { %2626 = vrcp.f32 %v1357_v23  ;;  %v1358_v57 = vadd.f32 1.0, %v2615_v53 }
 0x3cf   :  { %2628 = vrcp.f32 %v1360_v38 }
 0x3d0   :  { %2630 = vrcp.f32 %v1358_v57 }
 0x3d2   :  { %v2617_v24 = vpop.eup %2616 }
 0x3d3   :  { %v2619_v37 = vpop.eup %2618  ;;  %v1363_v25 = vadd.f32 1.0, %v2617_v24 }
 0x3d4   :  { %v2621_v26 = vpop.eup %2620  ;;  %v1361_v44 = vadd.f32 1.0, %v2619_v37 }
 0x3d5   :  { %v2623_v16 = vpop.eup %2622  ;;  %2632 = vrcp.f32 %v1363_v25  ;;  %v1364_v14 = vadd.f32 1.0, %v2621_v26 }
 0x3d6   :  { %2634 = vrcp.f32 %v1361_v44  ;;  %v1362_v17 = vadd.f32 1.0, %v2623_v16 }
 0x3d7   :  { %v2625_v61 = vpop.eup %2624  ;;  %2636 = vrcp.f32 %v1364_v14 }
 0x3d8   :  { %v2627_v31 = vpop.eup %2626  ;;  %2638 = vrcp.f32 %v1362_v17  ;;  %v1391_v28 = vmul.f32 %v2625_v61, %v3340_v48 }
 0x3d9   :  { %v2629_v35 = vpop.eup %2628  ;;  %v1389_v39 = vmul.f32 %v2627_v31, %v3343_v51 }
 0x3da   :  { %v2631_v27 = vpop.eup %2630  ;;  %v1392_v30 = vmul.f32 %v2629_v35, %v3347_v41 }
 0x3db   :  { %v1390_v40 = vmul.f32 %v2631_v27, %v1250_v7 }
 0x3dc   :  { %v1423_v56 = vpack.c.bf16 %v1392_v30, %v1391_v28 }
 0x3dd   :  { %v1422_v47 = vpack.c.bf16 %v1390_v40, %v1389_v39 }
 0x3df   :  { %v2633_v32 = vpop.eup %2632  ;;  %2288 = vmatprep.mubr.bf16.mxu1 %v1422_v47 }
 0x3e0   :  { %v2635_v45 = vpop.eup %2634  ;;  %2289 = vmatmul.mubr.bf16.vlgmr.msra.gmra.mrb[16].mxu1 %v1423_v56  ;;  %v1395_v46 = vmul.f32 %v2633_v32, %v1271_v54 }
 0x3e1   :  { %v2637_v4 = vpop.eup %2636  ;;  %v1393_v2 = vmul.f32 %v2635_v45, %v1263_v6 }
 0x3e2   :  { %v2639_v58 = vpop.eup %2638  ;;  %v1396_v62 = vmul.f32 %v2637_v4, %v1274_v11 }
 0x3e3   :  { %v1394_v52 = vmul.f32 %v2639_v58, %v1266_v20 }
 0x3e4   :  { %v1425_v60 = vpack.c.bf16 %v1396_v62, %v1395_v46 }
 0x3e5   :  { %v1424_v63 = vpack.c.bf16 %v1394_v52, %v1393_v2 }
 0x3e7   :  { %2292 = vmatprep.mubr.bf16.mxu1 %v1424_v63 }
 0x3e8   :  { %2293 = vmatmul.mubr.bf16.gmra.mrb[20].mxu1 %v1425_v60  ;;  %v2266_v48 = vpop.f32.mrb[24].mxu0 }
 0x3e9   :  { %v1287_v51 = vadd.f32 %v2266_v48, %v3337_v19  ;;  %v1278_v41 = vpop.f32.mrb[25].mxu0 }
 0x3ea   :  { %v1279_v0 = vadd.f32 %v3337_v19, %v1278_v41  ;;  %v2267_v7 = vpop.f32.mrb[26].mxu0 }
 0x3eb   :  { %v1319_v1 = vsub.f32 0.0, %v1287_v51  ;;  %v1290_v33 = vadd.f32 %v2267_v7, %v3337_v19  ;;  %v1281_v21 = vpop.f32.mrb[27].mxu0  ;;  %v2408_v7 = vld [vmem:[%s3563_s11] sm:$0xff]  }
 0x3ec   :  { %v1317_v36 = vsub.f32 0.0, %v1279_v0  ;;  %v1282_v3 = vadd.f32 %v3337_v19, %v1281_v21  ;;  %2304 = vmatprep.subr.bf16.mxu0 %v2408_v7  ;;  %2336 = vmatprep.subr.bf16.mxu1 %v2408_v7  ;;  %v2411_v21 = vld [vmem:[%s3563_s11 + $0x18] sm:$0xff]  }
 0x3ed   :  { %v1345_v34 = vmul.f32 1.442695, %v1319_v1  ;;  %v1320_v49 = vsub.f32 0.0, %v1290_v33  ;;  %2305 = vmatpush3.bf16.msra.mxu0 %v2408_v7  ;;  %v2409_v1 = vld [vmem:[%s3563_s11 + $0x8] sm:$0xff]   ;;  %2344 = vmatpush3.bf16.msra.mxu1 %v2408_v7 }
 0x3ee   :  { %v1341_v54 = vmul.f32 1.442695, %v1317_v36  ;;  %v1318_v5 = vsub.f32 0.0, %v1282_v3  ;;  %2306 = vmatprep.subr.bf16.mxu0 %v2409_v1  ;;  %2337 = vmatprep.subr.bf16.mxu1 %v2409_v1  ;;  %v2412_v36 = vld [vmem:[%s3563_s11 + $0x20] sm:$0xff]  }
 0x3ef   :  { %2640 = vpow2.f32 %v1345_v34  ;;  %v1347_v6 = vmul.f32 1.442695, %v1320_v49  ;;  %v2414_v34 = vld [vmem:[%s3563_s11 + $0x30] sm:$0xff]   ;;  %v2415_v49 = vld [vmem:[%s3563_s11 + $0x38] sm:$0xff]  }
 0x3f0   :  { %2642 = vpow2.f32 %v1341_v54  ;;  %v1343_v8 = vmul.f32 1.442695, %v1318_v5  ;;  %v3394_v54 = vld [vmem:[%s3564_s10] ss:$0 sm:$0xff] }
 0x3f1   :  { %2644 = vpow2.f32 %v1347_v6  ;;  %2307 = vmatpush3.bf16.msra.mxu0 %v2409_v1  ;;  %2345 = vmatpush3.bf16.msra.mxu1 %v2409_v1 }
 0x3f2   :  { %2646 = vpow2.f32 %v1343_v8 }
 0x3f9   :  { %v2641_v10 = vpop.eup %2640 }
 0x3fa   :  { %v2643_v11 = vpop.eup %2642  ;;  %v1367_v50 = vadd.f32 1.0, %v2641_v10 }
 0x3fb   :  { %v2645_v29 = vpop.eup %2644  ;;  %v1365_v20 = vadd.f32 1.0, %v2643_v11 }
 0x3fc   :  { %v2647_v42 = vpop.eup %2646  ;;  %2648 = vrcp.f32 %v1367_v50  ;;  %v1368_v43 = vadd.f32 1.0, %v2645_v29 }
 0x3fd   :  { %2650 = vrcp.f32 %v1365_v20  ;;  %v1366_v9 = vadd.f32 1.0, %v2647_v42 }
 0x3fe   :  { %2652 = vrcp.f32 %v1368_v43 }
 0x3ff   :  { %2654 = vrcp.f32 %v1366_v9 }
 0x406   :  { %v2649_v18 = vpop.eup %2648 }
 0x407   :  { %v2651_v55 = vpop.eup %2650  ;;  %v1399_v59 = vmul.f32 %v2649_v18, %v1287_v51 }
 0x408   :  { %v2653_v13 = vpop.eup %2652  ;;  %v1397_v15 = vmul.f32 %v2651_v55, %v1279_v0 }
 0x409   :  { %v2655_v22 = vpop.eup %2654  ;;  %v1400_v12 = vmul.f32 %v2653_v13, %v1290_v33  ;;  %v2410_v33 = vld [vmem:[%s3563_s11 + $0x10] sm:$0xff]  }
 0x40a   :  { %v1398_v23 = vmul.f32 %v2655_v22, %v1282_v3  ;;  %2308 = vmatprep.subr.bf16.mxu0 %v2410_v33  ;;  %2338 = vmatprep.subr.bf16.mxu1 %v2410_v33  ;;  %v2413_v3 = vld [vmem:[%s3563_s11 + $0x28] sm:$0xff]  }
 0x40b   :  { %v1427_v53 = vpack.c.bf16 %v1400_v12, %v1399_v59  ;;  %2309 = vmatpush3.bf16.msra.mxu0 %v2410_v33  ;;  %2346 = vmatpush3.bf16.msra.mxu1 %v2410_v33 }
 0x40c   :  { %v1426_v38 = vpack.c.bf16 %v1398_v23, %v1397_v15  ;;  %2310 = vmatprep.subr.bf16.mxu0 %v2411_v21  ;;  %2339 = vmatprep.subr.bf16.mxu1 %v2411_v21 }
 0x40e   :  { %2296 = vmatprep.mubr.bf16.mxu1 %v1426_v38 }
 0x40f   :  { %2297 = vmatmul.mubr.bf16.gmra.mrb[24].mxu1 %v1427_v53  ;;  %2311 = vmatpush3.bf16.msra.mxu0 %v2411_v21 }
 0x410   :  { %2347 = vmatpush3.bf16.msra.mxu1 %v2411_v21  ;;  %2312 = vmatprep.subr.bf16.mxu0 %v2412_v36 }
 0x411   :  { %2340 = vmatprep.subr.bf16.mxu1 %v2412_v36 }
 0x413   :  { %2313 = vmatpush3.bf16.msra.mxu0 %v2412_v36 }
 0x414   :  { %v2270_v57 = vpop.f32.mrb[28].mxu0  ;;  %2348 = vmatpush3.bf16.msra.mxu1 %v2412_v36  ;;  %2314 = vmatprep.subr.bf16.mxu0 %v2413_v3 }
 0x415   :  { %v1303_v24 = vadd.f32 %v2270_v57, %v3337_v19  ;;  %v1294_v37 = vpop.f32.mrb[29].mxu0  ;;  %2341 = vmatprep.subr.bf16.mxu1 %v2413_v3 }
 0x416   :  { %v1295_v25 = vadd.f32 %v3337_v19, %v1294_v37  ;;  %v2271_v26 = vpop.f32.mrb[30].mxu0 }
 0x417   :  { %v1323_v44 = vsub.f32 0.0, %v1303_v24  ;;  %v1306_v16 = vadd.f32 %v2271_v26, %v3337_v19  ;;  %v1297_v14 = vpop.f32.mrb[31].mxu0  ;;  %2315 = vmatpush3.bf16.msra.mxu0 %v2413_v3 }
 0x418   :  { %v1321_v17 = vsub.f32 0.0, %v1295_v25  ;;  %v1298_v61 = vadd.f32 %v3337_v19, %v1297_v14  ;;  %2349 = vmatpush3.bf16.msra.mxu1 %v2413_v3  ;;  %2316 = vmatprep.subr.bf16.mxu0 %v2414_v34 }
 0x419   :  { %v1353_v31 = vmul.f32 1.442695, %v1323_v44  ;;  %v1324_v35 = vsub.f32 0.0, %v1306_v16  ;;  %2342 = vmatprep.subr.bf16.mxu1 %v2414_v34 }
 0x41a   :  { %v1349_v27 = vmul.f32 1.442695, %v1321_v17  ;;  %v1322_v28 = vsub.f32 0.0, %v1298_v61 }
 0x41b   :  { %2656 = vpow2.f32 %v1353_v31  ;;  %v1355_v30 = vmul.f32 1.442695, %v1324_v35  ;;  %2317 = vmatpush3.bf16.msra.mxu0 %v2414_v34 }
 0x41c   :  { %2658 = vpow2.f32 %v1349_v27  ;;  %v1351_v39 = vmul.f32 1.442695, %v1322_v28  ;;  %2350 = vmatpush3.bf16.msra.mxu1 %v2414_v34  ;;  %2318 = vmatprep.subr.bf16.mxu0 %v2415_v49 }
 0x41d   :  { %2660 = vpow2.f32 %v1355_v30  ;;  %2343 = vmatprep.subr.bf16.mxu1 %v2415_v49 }
 0x41e   :  { %2662 = vpow2.f32 %v1351_v39 }
 0x41f   :  { %2319 = vmatpush3.bf16.msra.mxu0 %v2415_v49 }
 0x420   :  { %2351 = vmatpush3.bf16.msra.mxu1 %v2415_v49 }
 0x425   :  { %v2657_v40 = vpop.eup %2656 }
 0x426   :  { %v2659_v56 = vpop.eup %2658  ;;  %v1371_v47 = vadd.f32 1.0, %v2657_v40 }
 0x427   :  { %v2661_v32 = vpop.eup %2660  ;;  %v1369_v45 = vadd.f32 1.0, %v2659_v56 }
 0x428   :  { %v2663_v4 = vpop.eup %2662  ;;  %2664 = vrcp.f32 %v1371_v47  ;;  %v1372_v58 = vadd.f32 1.0, %v2661_v32 }
 0x429   :  { %2666 = vrcp.f32 %v1369_v45  ;;  %v1370_v19 = vadd.f32 1.0, %v2663_v4 }
 0x42a   :  { %2668 = vrcp.f32 %v1372_v58 }
 0x42b   :  { %2670 = vrcp.f32 %v1370_v19 }
 0x432   :  { %v2665_v46 = vpop.eup %2664 }
 0x433   :  { %v2667_v62 = vpop.eup %2666  ;;  %v1403_v60 = vmul.f32 %v2665_v46, %v1303_v24 }
 0x434   :  { %v2669_v2 = vpop.eup %2668  ;;  %v1401_v48 = vmul.f32 %v2667_v62, %v1295_v25 }
 0x435   :  { %v2671_v52 = vpop.eup %2670  ;;  %v1404_v63 = vmul.f32 %v2669_v2, %v1306_v16 }
 0x436   :  { %v1402_v51 = vmul.f32 %v2671_v52, %v1298_v61 }
 0x437   :  { %v1429_v41 = vpack.c.bf16 %v1404_v63, %v1403_v60 }
 0x438   :  { %v1428_v0 = vpack.c.bf16 %v1402_v51, %v1401_v48 }
 0x43a   :  { %2300 = vmatprep.mubr.bf16.mxu1 %v1428_v0 }
 0x43b   :  { %2301 = vmatmul.mubr.bf16.gmra.mrb[28].mxu1 %v1429_v41 }
 0x4b3   :  { %v2290_v5 = vpop.f32.mrb[16].mxu1 }
 0x4b4   :  { %v3397_v6 = vadd.f32 %v2290_v5, %v3394_v54  ;;  %v1518_v8 = vpop.f32.mrb[17].mxu1 }
 0x4b5   :  { %v3400_v10 = vadd.f32 %v3394_v54, %v1518_v8  ;;  %v2291_v11 = vpop.f32.mrb[18].mxu1 }
 0x4b6   :  { %v1583_v50 = vsub.f32 0.0, %v3397_v6  ;;  %v3404_v29 = vadd.f32 %v2291_v11, %v3394_v54  ;;  %v1521_v20 = vpop.f32.mrb[19].mxu1 }
 0x4b7   :  { %v1581_v42 = vsub.f32 0.0, %v3400_v10  ;;  %v1522_v43 = vadd.f32 %v3394_v54, %v1521_v20 }
 0x4b8   :  { %v1601_v9 = vmul.f32 1.442695, %v1583_v50  ;;  %v1584_v18 = vsub.f32 0.0, %v3404_v29 }
 0x4b9   :  { %v1597_v55 = vmul.f32 1.442695, %v1581_v42  ;;  %v1582_v13 = vsub.f32 0.0, %v1522_v43 }
 0x4ba   :  { %2672 = vpow2.f32 %v1601_v9  ;;  %v1603_v22 = vmul.f32 1.442695, %v1584_v18 }
 0x4bb   :  { %2674 = vpow2.f32 %v1597_v55  ;;  %v1599_v59 = vmul.f32 1.442695, %v1582_v13  ;;  %v2294_v12 = vpop.f32.mrb[20].mxu1 }
 0x4bc   :  { %2676 = vpow2.f32 %v1603_v22  ;;  %v1543_v15 = vadd.f32 %v2294_v12, %v3394_v54  ;;  %v1534_v23 = vpop.f32.mrb[21].mxu1 }
 0x4bd   :  { %2678 = vpow2.f32 %v1599_v59  ;;  %v1535_v53 = vadd.f32 %v3394_v54, %v1534_v23  ;;  %v2295_v38 = vpop.f32.mrb[22].mxu1 }
 0x4be   :  { %v1587_v57 = vsub.f32 0.0, %v1543_v15  ;;  %v1546_v24 = vadd.f32 %v2295_v38, %v3394_v54  ;;  %v1537_v37 = vpop.f32.mrb[23].mxu1 }
 0x4bf   :  { %v1585_v25 = vsub.f32 0.0, %v1535_v53  ;;  %v1538_v26 = vadd.f32 %v3394_v54, %v1537_v37 }
 0x4c0   :  { %v1609_v44 = vmul.f32 1.442695, %v1587_v57  ;;  %v1588_v16 = vsub.f32 0.0, %v1546_v24 }
 0x4c1   :  { %v1605_v14 = vmul.f32 1.442695, %v1585_v25  ;;  %v1586_v17 = vsub.f32 0.0, %v1538_v26 }
 0x4c2   :  { %2680 = vpow2.f32 %v1609_v44  ;;  %v1611_v61 = vmul.f32 1.442695, %v1588_v16 }
 0x4c3   :  { %2682 = vpow2.f32 %v1605_v14  ;;  %v1607_v31 = vmul.f32 1.442695, %v1586_v17 }
 0x4c4   :  { %v2673_v35 = vpop.eup %2672  ;;  %2684 = vpow2.f32 %v1611_v61 }
 0x4c5   :  { %v2675_v27 = vpop.eup %2674  ;;  %v1631_v28 = vadd.f32 1.0, %v2673_v35  ;;  %2686 = vpow2.f32 %v1607_v31 }
 0x4c6   :  { %v2677_v30 = vpop.eup %2676  ;;  %v1629_v39 = vadd.f32 1.0, %v2675_v27 }
 0x4c7   :  { %v2679_v40 = vpop.eup %2678  ;;  %2688 = vrcp.f32 %v1631_v28  ;;  %v1632_v56 = vadd.f32 1.0, %v2677_v30 }
 0x4c8   :  { %2690 = vrcp.f32 %v1629_v39  ;;  %v1630_v47 = vadd.f32 1.0, %v2679_v40 }
 0x4c9   :  { %2692 = vrcp.f32 %v1632_v56 }
 0x4ca   :  { %2694 = vrcp.f32 %v1630_v47 }
 0x4cc   :  { %v2681_v32 = vpop.eup %2680 }
 0x4cd   :  { %v2683_v45 = vpop.eup %2682  ;;  %v1635_v4 = vadd.f32 1.0, %v2681_v32 }
 0x4ce   :  { %v2685_v58 = vpop.eup %2684  ;;  %v1633_v19 = vadd.f32 1.0, %v2683_v45 }
 0x4cf   :  { %v2687_v46 = vpop.eup %2686  ;;  %2696 = vrcp.f32 %v1635_v4  ;;  %v1636_v62 = vadd.f32 1.0, %v2685_v58 }
 0x4d0   :  { %2698 = vrcp.f32 %v1633_v19  ;;  %v1634_v2 = vadd.f32 1.0, %v2687_v46 }
 0x4d1   :  { %v2689_v52 = vpop.eup %2688  ;;  %2700 = vrcp.f32 %v1636_v62 }
 0x4d2   :  { %v2691_v60 = vpop.eup %2690  ;;  %2702 = vrcp.f32 %v1634_v2  ;;  %v1663_v51 = vmul.f32 %v2689_v52, %v3397_v6 }
 0x4d3   :  { %v2693_v63 = vpop.eup %2692  ;;  %v1661_v0 = vmul.f32 %v2691_v60, %v3400_v10 }
 0x4d4   :  { %v2695_v48 = vpop.eup %2694  ;;  %v1664_v41 = vmul.f32 %v2693_v63, %v3404_v29 }
 0x4d5   :  { %v1662_v7 = vmul.f32 %v2695_v48, %v1522_v43 }
 0x4d6   :  { %v1695_v1 = vpack.c.bf16 %v1664_v41, %v1663_v51 }
 0x4d7   :  { %v1694_v33 = vpack.c.bf16 %v1662_v7, %v1661_v0 }
 0x4d9   :  { %v2697_v21 = vpop.eup %2696  ;;  %2320 = vmatprep.mubr.bf16.mxu0 %v1694_v33 }
 0x4da   :  { %v2699_v36 = vpop.eup %2698  ;;  %2321 = vmatmul.mubr.bf16.vlgmr.msra.gmra.mrb[32].mxu0 %v1695_v1  ;;  %v1667_v49 = vmul.f32 %v2697_v21, %v1543_v15 }
 0x4db   :  { %v2701_v3 = vpop.eup %2700  ;;  %v1665_v8 = vmul.f32 %v2699_v36, %v1535_v53 }
 0x4dc   :  { %v2703_v34 = vpop.eup %2702  ;;  %v1668_v5 = vmul.f32 %v2701_v3, %v1546_v24 }
 0x4dd   :  { %v1666_v11 = vmul.f32 %v2703_v34, %v1538_v26 }
 0x4de   :  { %v1697_v50 = vpack.c.bf16 %v1668_v5, %v1667_v49 }
 0x4df   :  { %v1696_v20 = vpack.c.bf16 %v1666_v11, %v1665_v8 }
 0x4e1   :  { %2324 = vmatprep.mubr.bf16.mxu0 %v1696_v20 }
 0x4e2   :  { %2325 = vmatmul.mubr.bf16.gmra.mrb[36].mxu0 %v1697_v50  ;;  %v2298_v6 = vpop.f32.mrb[24].mxu1 }
 0x4e3   :  { %v1559_v10 = vadd.f32 %v2298_v6, %v3394_v54  ;;  %v1550_v29 = vpop.f32.mrb[25].mxu1 }
 0x4e4   :  { %v1551_v42 = vadd.f32 %v3394_v54, %v1550_v29  ;;  %v2299_v43 = vpop.f32.mrb[26].mxu1 }
 0x4e5   :  { %v1591_v9 = vsub.f32 0.0, %v1559_v10  ;;  %v1562_v18 = vadd.f32 %v2299_v43, %v3394_v54  ;;  %v1553_v55 = vpop.f32.mrb[27].mxu1  ;;  %v3427_v43 = vld [vmem:[%s3565_s12] ss:$0 sm:$0xff] }
 0x4e6   :  { %v1589_v13 = vsub.f32 0.0, %v1551_v42  ;;  %v1554_v22 = vadd.f32 %v3394_v54, %v1553_v55 }
 0x4e7   :  { %v1617_v59 = vmul.f32 1.442695, %v1591_v9  ;;  %v1592_v12 = vsub.f32 0.0, %v1562_v18 }
 0x4e8   :  { %v1613_v15 = vmul.f32 1.442695, %v1589_v13  ;;  %v1590_v23 = vsub.f32 0.0, %v1554_v22 }
 0x4e9   :  { %2704 = vpow2.f32 %v1617_v59  ;;  %v1619_v53 = vmul.f32 1.442695, %v1592_v12 }
 0x4ea   :  { %2706 = vpow2.f32 %v1613_v15  ;;  %v1615_v38 = vmul.f32 1.442695, %v1590_v23 }
 0x4eb   :  { %2708 = vpow2.f32 %v1619_v53 }
 0x4ec   :  { %2710 = vpow2.f32 %v1615_v38 }
 0x4f3   :  { %v2705_v57 = vpop.eup %2704 }
 0x4f4   :  { %v2707_v24 = vpop.eup %2706  ;;  %v1639_v37 = vadd.f32 1.0, %v2705_v57 }
 0x4f5   :  { %v2709_v25 = vpop.eup %2708  ;;  %v1637_v26 = vadd.f32 1.0, %v2707_v24 }
 0x4f6   :  { %v2711_v44 = vpop.eup %2710  ;;  %2712 = vrcp.f32 %v1639_v37  ;;  %v1640_v16 = vadd.f32 1.0, %v2709_v25  ;;  %v20_v25 = vstv %s3566_s14 }
 0x4f7   :  { %2714 = vrcp.f32 %v1637_v26  ;;  %v1638_v14 = vadd.f32 1.0, %v2711_v44  ;;  %21 = vst [vmem:[#allocation2] sm:$0x1] %v20_v25 }
 0x4f8   :  { %2716 = vrcp.f32 %v1640_v16 }
 0x4f9   :  { %2718 = vrcp.f32 %v1638_v14 }
 0x500   :  { %v2713_v17 = vpop.eup %2712 }
 0x501   :  { %v2715_v61 = vpop.eup %2714  ;;  %v1671_v27 = vmul.f32 %v2713_v17, %v1559_v10 }
 0x502   :  { %v2717_v31 = vpop.eup %2716  ;;  %v1669_v30 = vmul.f32 %v2715_v61, %v1551_v42 }
 0x503   :  { %v2719_v35 = vpop.eup %2718  ;;  %v1672_v28 = vmul.f32 %v2717_v31, %v1562_v18 }
 0x504   :  { %v1670_v39 = vmul.f32 %v2719_v35, %v1554_v22 }
 0x505   :  { %v1699_v40 = vpack.c.bf16 %v1672_v28, %v1671_v27 }
 0x506   :  { %v1698_v56 = vpack.c.bf16 %v1670_v39, %v1669_v30 }
 0x508   :  { %2328 = vmatprep.mubr.bf16.mxu1 %v1698_v56 }
 0x509   :  { %2329 = vmatmul.mubr.bf16.vlgmr.msra.gmra.mrb[32].mxu1 %v1699_v40 }
 0x50e   :  { %v2302_v47 = vpop.f32.mrb[28].mxu1 }
 0x50f   :  { %v1575_v32 = vadd.f32 %v2302_v47, %v3394_v54  ;;  %v1566_v45 = vpop.f32.mrb[29].mxu1 }
 0x510   :  { %v1567_v4 = vadd.f32 %v3394_v54, %v1566_v45  ;;  %v2303_v58 = vpop.f32.mrb[30].mxu1 }
 0x511   :  { %v1595_v19 = vsub.f32 0.0, %v1575_v32  ;;  %v1578_v46 = vadd.f32 %v2303_v58, %v3394_v54  ;;  %v1569_v62 = vpop.f32.mrb[31].mxu1 }
 0x512   :  { %v1593_v2 = vsub.f32 0.0, %v1567_v4  ;;  %v1570_v52 = vadd.f32 %v3394_v54, %v1569_v62 }
 0x513   :  { %v1625_v60 = vmul.f32 1.442695, %v1595_v19  ;;  %v1596_v63 = vsub.f32 0.0, %v1578_v46 }
 0x514   :  { %v1621_v48 = vmul.f32 1.442695, %v1593_v2  ;;  %v1594_v51 = vsub.f32 0.0, %v1570_v52 }
 0x515   :  { %2720 = vpow2.f32 %v1625_v60  ;;  %v1627_v41 = vmul.f32 1.442695, %v1596_v63 }
 0x516   :  { %2722 = vpow2.f32 %v1621_v48  ;;  %v1623_v0 = vmul.f32 1.442695, %v1594_v51 }
 0x517   :  { %2724 = vpow2.f32 %v1627_v41 }
 0x518   :  { %2726 = vpow2.f32 %v1623_v0 }
 0x51f   :  { %v2721_v7 = vpop.eup %2720 }
 0x520   :  { %v2723_v1 = vpop.eup %2722  ;;  %v1643_v33 = vadd.f32 1.0, %v2721_v7 }
 0x521   :  { %v2725_v21 = vpop.eup %2724  ;;  %v1641_v36 = vadd.f32 1.0, %v2723_v1 }
 0x522   :  { %v2727_v3 = vpop.eup %2726  ;;  %2728 = vrcp.f32 %v1643_v33  ;;  %v1644_v34 = vadd.f32 1.0, %v2725_v21 }
 0x523   :  { %2730 = vrcp.f32 %v1641_v36  ;;  %v1642_v54 = vadd.f32 1.0, %v2727_v3  ;;  %v3458_v3 = vld [vmem:[%s3567_s13] ss:$0 sm:$0xff] }
 0x524   :  { %2732 = vrcp.f32 %v1644_v34 }
 0x525   :  { %2734 = vrcp.f32 %v1642_v54 }
 0x52c   :  { %v2729_v49 = vpop.eup %2728 }
 0x52d   :  { %v2731_v5 = vpop.eup %2730  ;;  %v1675_v50 = vmul.f32 %v2729_v49, %v1575_v32 }
 0x52e   :  { %v2733_v8 = vpop.eup %2732  ;;  %v1673_v6 = vmul.f32 %v2731_v5, %v1567_v4 }
 0x52f   :  { %v2735_v11 = vpop.eup %2734  ;;  %v1676_v20 = vmul.f32 %v2733_v8, %v1578_v46 }
 0x530   :  { %v1674_v10 = vmul.f32 %v2735_v11, %v1570_v52 }
 0x531   :  { %v1701_v29 = vpack.c.bf16 %v1676_v20, %v1675_v50 }
 0x532   :  { %v1700_v42 = vpack.c.bf16 %v1674_v10, %v1673_v6 }
 0x534   :  { %2332 = vmatprep.mubr.bf16.mxu1 %v1700_v42 }
 0x535   :  { %2333 = vmatmul.mubr.bf16.gmra.mrb[36].mxu1 %v1701_v29 }
 0x5ad   :  { %v2322_v9 = vpop.f32.mrb[32].mxu0 }
 0x5ae   :  { %v3430_v18 = vadd.f32 %v2322_v9, %v3427_v43  ;;  %v1790_v55 = vpop.f32.mrb[33].mxu0 }
 0x5af   :  { %v3433_v13 = vadd.f32 %v3427_v43, %v1790_v55  ;;  %v2323_v22 = vpop.f32.mrb[34].mxu0 }
 0x5b0   :  { %v1855_v59 = vsub.f32 0.0, %v3430_v18  ;;  %v3437_v12 = vadd.f32 %v2323_v22, %v3427_v43  ;;  %v1793_v15 = vpop.f32.mrb[35].mxu0 }
 0x5b1   :  { %v1853_v23 = vsub.f32 0.0, %v3433_v13  ;;  %v3441_v53 = vadd.f32 %v3427_v43, %v1793_v15 }
 0x5b2   :  { %v1873_v38 = vmul.f32 1.442695, %v1855_v59  ;;  %v1856_v57 = vsub.f32 0.0, %v3437_v12 }
 0x5b3   :  { %v1869_v24 = vmul.f32 1.442695, %v1853_v23  ;;  %v1854_v37 = vsub.f32 0.0, %v3441_v53 }
 0x5b4   :  { %2736 = vpow2.f32 %v1873_v38  ;;  %v1875_v26 = vmul.f32 1.442695, %v1856_v57 }
 0x5b5   :  { %2738 = vpow2.f32 %v1869_v24  ;;  %v1871_v44 = vmul.f32 1.442695, %v1854_v37  ;;  %v2326_v16 = vpop.f32.mrb[36].mxu0 }
 0x5b6   :  { %2740 = vpow2.f32 %v1875_v26  ;;  %v1815_v14 = vadd.f32 %v2326_v16, %v3427_v43  ;;  %v1806_v17 = vpop.f32.mrb[37].mxu0 }
 0x5b7   :  { %2742 = vpow2.f32 %v1871_v44  ;;  %v3450_v61 = vadd.f32 %v3427_v43, %v1806_v17  ;;  %v2327_v31 = vpop.f32.mrb[38].mxu0 }
 0x5b8   :  { %v1859_v35 = vsub.f32 0.0, %v1815_v14  ;;  %v1818_v27 = vadd.f32 %v2327_v31, %v3427_v43  ;;  %v1809_v28 = vpop.f32.mrb[39].mxu0 }
 0x5b9   :  { %v1857_v30 = vsub.f32 0.0, %v3450_v61  ;;  %v1810_v39 = vadd.f32 %v3427_v43, %v1809_v28 }
 0x5ba   :  { %v1881_v40 = vmul.f32 1.442695, %v1859_v35  ;;  %v1860_v56 = vsub.f32 0.0, %v1818_v27 }
 0x5bb   :  { %v1877_v47 = vmul.f32 1.442695, %v1857_v30  ;;  %v1858_v32 = vsub.f32 0.0, %v1810_v39 }
 0x5bc   :  { %2744 = vpow2.f32 %v1881_v40  ;;  %v1883_v45 = vmul.f32 1.442695, %v1860_v56 }
 0x5bd   :  { %2746 = vpow2.f32 %v1877_v47  ;;  %v1879_v4 = vmul.f32 1.442695, %v1858_v32 }
 0x5be   :  { %v2737_v58 = vpop.eup %2736  ;;  %2748 = vpow2.f32 %v1883_v45 }
 0x5bf   :  { %v2739_v19 = vpop.eup %2738  ;;  %v1903_v46 = vadd.f32 1.0, %v2737_v58  ;;  %2750 = vpow2.f32 %v1879_v4 }
 0x5c0   :  { %v2741_v62 = vpop.eup %2740  ;;  %v1901_v2 = vadd.f32 1.0, %v2739_v19 }
 0x5c1   :  { %v2743_v52 = vpop.eup %2742  ;;  %2752 = vrcp.f32 %v1903_v46  ;;  %v1904_v60 = vadd.f32 1.0, %v2741_v62 }
 0x5c2   :  { %2754 = vrcp.f32 %v1901_v2  ;;  %v1902_v63 = vadd.f32 1.0, %v2743_v52 }
 0x5c3   :  { %2756 = vrcp.f32 %v1904_v60 }
 0x5c4   :  { %2758 = vrcp.f32 %v1902_v63 }
 0x5c6   :  { %v2745_v48 = vpop.eup %2744 }
 0x5c7   :  { %v2747_v51 = vpop.eup %2746  ;;  %v1907_v41 = vadd.f32 1.0, %v2745_v48 }
 0x5c8   :  { %v2749_v0 = vpop.eup %2748  ;;  %v1905_v7 = vadd.f32 1.0, %v2747_v51 }
 0x5c9   :  { %v2751_v1 = vpop.eup %2750  ;;  %2760 = vrcp.f32 %v1907_v41  ;;  %v1908_v33 = vadd.f32 1.0, %v2749_v0 }
 0x5ca   :  { %2762 = vrcp.f32 %v1905_v7  ;;  %v1906_v21 = vadd.f32 1.0, %v2751_v1 }
 0x5cb   :  { %v2753_v36 = vpop.eup %2752  ;;  %2764 = vrcp.f32 %v1908_v33 }
 0x5cc   :  { %v2755_v34 = vpop.eup %2754  ;;  %v1935_v54 = vmul.f32 %v2753_v36, %v3430_v18  ;;  %2766 = vrcp.f32 %v1906_v21 }
 0x5cd   :  { %v2757_v49 = vpop.eup %2756  ;;  %v1933_v5 = vmul.f32 %v2755_v34, %v3433_v13 }
 0x5ce   :  { %v2759_v8 = vpop.eup %2758  ;;  %v1959_v11 = vmul.f32 %v3458_v3, %v1935_v54  ;;  %v1936_v50 = vmul.f32 %v2757_v49, %v3437_v12 }
 0x5cf   :  { %v1934_v20 = vmul.f32 %v2759_v8, %v3441_v53  ;;  %v1957_v6 = vmul.f32 %v3458_v3, %v1933_v5 }
 0x5d0   :  { %1977 = vadd.xlane.f32.xlu0 %v1959_v11  ;;  %v1960_v42 = vmul.f32 %v3458_v3, %v1936_v50 }
 0x5d1   :  { %1973 = vadd.xlane.f32.xlu1 %v1957_v6  ;;  %v1958_v10 = vmul.f32 %v3458_v3, %v1934_v20 }
 0x5d3   :  { %v2761_v29 = vpop.eup %2760 }
 0x5d4   :  { %v2763_v9 = vpop.eup %2762  ;;  %v1939_v18 = vmul.f32 %v2761_v29, %v1815_v14  ;;  %1975 = vadd.xlane.f32.xlu0 %v1958_v10 }
 0x5d5   :  { %v2765_v55 = vpop.eup %2764  ;;  %1979 = vadd.xlane.f32.xlu1 %v1960_v42  ;;  %v1937_v22 = vmul.f32 %v2763_v9, %v3450_v61 }
 0x5d6   :  { %v2767_v13 = vpop.eup %2766  ;;  %v1940_v59 = vmul.f32 %v2765_v55, %v1818_v27  ;;  %v1963_v12 = vmul.f32 %v3458_v3, %v1939_v18 }
 0x5d7   :  { %v1938_v15 = vmul.f32 %v2767_v13, %v1810_v39  ;;  %v1961_v53 = vmul.f32 %v3458_v3, %v1937_v22 }
 0x5d8   :  { %1985 = vadd.xlane.f32.xlu0 %v1963_v12  ;;  %v1964_v23 = vmul.f32 %v3458_v3, %v1940_v59 }
 0x5d9   :  { %v1962_v57 = vmul.f32 %v3458_v3, %v1938_v15 }
 0x5da   :  { %1987 = vadd.xlane.f32.xlu1 %v1964_v23 }
 0x5dc   :  { %1981 = vadd.xlane.f32.xlu0 %v1961_v53  ;;  %v2330_v38 = vpop.f32.mrb[32].mxu1 }
 0x5dd   :  { %v1831_v24 = vadd.f32 %v2330_v38, %v3427_v43  ;;  %v1822_v37 = vpop.f32.mrb[33].mxu1 }
 0x5de   :  { %1983 = vadd.xlane.f32.xlu1 %v1962_v57  ;;  %v1823_v25 = vadd.f32 %v3427_v43, %v1822_v37  ;;  %v2331_v26 = vpop.f32.mrb[34].mxu1 }
 0x5df   :  { %v1863_v44 = vsub.f32 0.0, %v1831_v24  ;;  %v1834_v16 = vadd.f32 %v2331_v26, %v3427_v43  ;;  %v1825_v14 = vpop.f32.mrb[35].mxu1 }
 0x5e0   :  { %v1861_v17 = vsub.f32 0.0, %v1823_v25  ;;  %v1826_v61 = vadd.f32 %v3427_v43, %v1825_v14 }
 0x5e1   :  { %v1889_v31 = vmul.f32 1.442695, %v1863_v44  ;;  %v1864_v35 = vsub.f32 0.0, %v1834_v16 }
 0x5e2   :  { %v1885_v27 = vmul.f32 1.442695, %v1861_v17  ;;  %v1862_v28 = vsub.f32 0.0, %v1826_v61 }
 0x5e3   :  { %2768 = vpow2.f32 %v1889_v31  ;;  %v1891_v30 = vmul.f32 1.442695, %v1864_v35 }
 0x5e4   :  { %2770 = vpow2.f32 %v1885_v27  ;;  %v1887_v39 = vmul.f32 1.442695, %v1862_v28 }
 0x5e5   :  { %2772 = vpow2.f32 %v1891_v30 }
 0x5e6   :  { %2774 = vpow2.f32 %v1887_v39 }
 0x5ed   :  { %v2769_v40 = vpop.eup %2768 }
 0x5ee   :  { %v2771_v56 = vpop.eup %2770  ;;  %v1911_v47 = vadd.f32 1.0, %v2769_v40 }
 0x5ef   :  { %v2773_v32 = vpop.eup %2772  ;;  %v1909_v45 = vadd.f32 1.0, %v2771_v56 }
 0x5f0   :  { %v2775_v4 = vpop.eup %2774  ;;  %2776 = vrcp.f32 %v1911_v47  ;;  %v1912_v58 = vadd.f32 1.0, %v2773_v32 }
 0x5f1   :  { %2778 = vrcp.f32 %v1909_v45  ;;  %v1910_v19 = vadd.f32 1.0, %v2775_v4 }
 0x5f2   :  { %2780 = vrcp.f32 %v1912_v58 }
 0x5f3   :  { %2782 = vrcp.f32 %v1910_v19 }
 0x5fa   :  { %v2777_v46 = vpop.eup %2776 }
 0x5fb   :  { %v2779_v62 = vpop.eup %2778  ;;  %v1943_v2 = vmul.f32 %v2777_v46, %v1831_v24 }
 0x5fc   :  { %v2781_v52 = vpop.eup %2780  ;;  %v1941_v63 = vmul.f32 %v2779_v62, %v1823_v25 }
 0x5fd   :  { %v2783_v60 = vpop.eup %2782  ;;  %v1944_v48 = vmul.f32 %v2781_v52, %v1834_v16  ;;  %v1967_v51 = vmul.f32 %v3458_v3, %v1943_v2 }
 0x5fe   :  { %v1942_v41 = vmul.f32 %v2783_v60, %v1826_v61  ;;  %v1965_v7 = vmul.f32 %v3458_v3, %v1941_v63  ;;  %v2095_v61 = vld [vmem:[#allocation2] ss:$0 sm:$0xff] }
 0x5ff   :  { %1993 = vadd.xlane.f32.xlu0 %v1967_v51  ;;  %v1968_v0 = vmul.f32 %v3458_v3, %v1944_v48 }
 0x600   :  { %v1966_v1 = vmul.f32 %v3458_v3, %v1942_v41 }
 0x601   :  { %1995 = vadd.xlane.f32.xlu1 %v1968_v0 }
 0x603   :  { %1989 = vadd.xlane.f32.xlu0 %v1965_v7 }
 0x605   :  { %1991 = vadd.xlane.f32.xlu1 %v1966_v1 }
 0x608   :  { %v2334_v33 = vpop.f32.mrb[36].mxu1 }
 0x609   :  { %v1847_v21 = vadd.f32 %v2334_v33, %v3427_v43  ;;  %v1838_v36 = vpop.f32.mrb[37].mxu1 }
 0x60a   :  { %v1839_v34 = vadd.f32 %v3427_v43, %v1838_v36  ;;  %v2335_v54 = vpop.f32.mrb[38].mxu1 }
 0x60b   :  { %v1867_v49 = vsub.f32 0.0, %v1847_v21  ;;  %v1850_v5 = vadd.f32 %v2335_v54, %v3427_v43  ;;  %v1841_v8 = vpop.f32.mrb[39].mxu1 }
 0x60c   :  { %v1865_v11 = vsub.f32 0.0, %v1839_v34  ;;  %v1842_v50 = vadd.f32 %v3427_v43, %v1841_v8 }
 0x60d   :  { %v1897_v20 = vmul.f32 1.442695, %v1867_v49  ;;  %v1868_v6 = vsub.f32 0.0, %v1850_v5 }
 0x60e   :  { %v1893_v10 = vmul.f32 1.442695, %v1865_v11  ;;  %v1866_v29 = vsub.f32 0.0, %v1842_v50 }
 0x60f   :  { %2784 = vpow2.f32 %v1897_v20  ;;  %v1899_v42 = vmul.f32 1.442695, %v1868_v6 }
 0x610   :  { %2786 = vpow2.f32 %v1893_v10  ;;  %v1895_v9 = vmul.f32 1.442695, %v1866_v29 }
 0x611   :  { %2788 = vpow2.f32 %v1899_v42 }
 0x612   :  { %2790 = vpow2.f32 %v1895_v9 }
 0x619   :  { %v2785_v18 = vpop.eup %2784 }
 0x61a   :  { %v2787_v55 = vpop.eup %2786  ;;  %v1915_v13 = vadd.f32 1.0, %v2785_v18 }
 0x61b   :  { %v2789_v22 = vpop.eup %2788  ;;  %v1913_v59 = vadd.f32 1.0, %v2787_v55 }
 0x61c   :  { %v2791_v12 = vpop.eup %2790  ;;  %2792 = vrcp.f32 %v1915_v13  ;;  %v1916_v15 = vadd.f32 1.0, %v2789_v22 }
 0x61d   :  { %2794 = vrcp.f32 %v1913_v59  ;;  %v1914_v43 = vadd.f32 1.0, %v2791_v12 }
 0x61e   :  { %2796 = vrcp.f32 %v1916_v15 }
 0x61f   :  { %2798 = vrcp.f32 %v1914_v43 }
 0x626   :  { %v2793_v23 = vpop.eup %2792 }
 0x627   :  { %v2795_v53 = vpop.eup %2794  ;;  %v1947_v37 = vmul.f32 %v2793_v23, %v1847_v21 }
 0x628   :  { %v2797_v38 = vpop.eup %2796  ;;  %v1945_v57 = vmul.f32 %v2795_v53, %v1839_v34 }
 0x629   :  { %v2799_v24 = vpop.eup %2798  ;;  %v1948_v44 = vmul.f32 %v2797_v38, %v1850_v5  ;;  %v1971_v14 = vmul.f32 %v3458_v3, %v1947_v37 }
 0x62a   :  { %v1946_v25 = vmul.f32 %v2799_v24, %v1842_v50  ;;  %v1969_v26 = vmul.f32 %v3458_v3, %v1945_v57 }
 0x62b   :  { %v1972_v17 = vmul.f32 %v3458_v3, %v1948_v44 }
 0x62c   :  { %1997 = vadd.xlane.f32.xlu0 %v1969_v26  ;;  %v1970_v16 = vmul.f32 %v3458_v3, %v1946_v25 }
 0x62e   :  { %1999 = vadd.xlane.f32.xlu1 %v1970_v16 }
 0x630   :  { %2001 = vadd.xlane.f32.xlu0 %v1971_v14 }
 0x632   :  { %2003 = vadd.xlane.f32.xlu1 %v1972_v17 }
 0x65d   :  { %v1978_v31 = vpop.xlane.xlu0 %1977 }
 0x65e   :  { %v2013_v35 = vadd.f32 %v2095_v61, %v1978_v31  ;;  %v1974_v27 = vpop.xlane.xlu1 %1973 }
 0x65f   :  { %v2011_v28 = vadd.f32 %v2095_v61, %v1974_v27 }
 0x660   :  { %2030 = vst.msk [vmem:[%s3568_s15 + $0x10] sm:$0xff] %vm2027_vm0, %v2013_v35 }
 0x661   :  { %2028 = vst.msk [vmem:[%s3568_s15] sm:$0xff] %vm2027_vm0, %v2011_v28  ;;  %v1976_v30 = vpop.xlane.xlu0 %1975 }
 0x662   :  { %v2012_v39 = vadd.f32 %v2095_v61, %v1976_v30  ;;  %v1980_v3 = vpop.xlane.xlu1 %1979 }
 0x663   :  { %v2014_v40 = vadd.f32 %v2095_v61, %v1980_v3 }
 0x664   :  { %2029 = vst.msk [vmem:[%s3568_s15 + $0x8] sm:$0xff] %vm2027_vm0, %v2012_v39 }
 0x665   :  { %2031 = vst.msk [vmem:[%s3568_s15 + $0x18] sm:$0xff] %vm2027_vm0, %v2014_v40  ;;  %v1986_v56 = vpop.xlane.xlu0 %1985 }
 0x666   :  { %v2017_v47 = vadd.f32 %v2095_v61, %v1986_v56 }
 0x667   :  { %v1988_v32 = vpop.xlane.xlu1 %1987 }
 0x668   :  { %2034 = vst.msk [vmem:[%s3568_s15 + $0x30] sm:$0xff] %vm2027_vm0, %v2017_v47  ;;  %v2018_v45 = vadd.f32 %v2095_v61, %v1988_v32 }
 0x669   :  { %v1982_v4 = vpop.xlane.xlu0 %1981 }
 0x66a   :  { %2035 = vst.msk [vmem:[%s3568_s15 + $0x38] sm:$0xff] %vm2027_vm0, %v2018_v45  ;;  %v2015_v58 = vadd.f32 %v2095_v61, %v1982_v4 }
 0x66b   :  { %v1984_v19 = vpop.xlane.xlu1 %1983 }
 0x66c   :  { %2032 = vst.msk [vmem:[%s3568_s15 + $0x20] sm:$0xff] %vm2027_vm0, %v2015_v58  ;;  %v2016_v46 = vadd.f32 %v2095_v61, %v1984_v19 }
 0x66e   :  { %2033 = vst.msk [vmem:[%s3568_s15 + $0x28] sm:$0xff] %vm2027_vm0, %v2016_v46 }
 0x68c   :  { %v1994_v62 = vpop.xlane.xlu0 %1993 }
 0x68d   :  { %v2021_v2 = vadd.f32 %v2095_v61, %v1994_v62 }
 0x68e   :  { %v1996_v52 = vpop.xlane.xlu1 %1995 }
 0x68f   :  { %2038 = vst.msk [vmem:[%s3568_s15 + $0x50] sm:$0xff] %vm2027_vm0, %v2021_v2  ;;  %v2022_v60 = vadd.f32 %v2095_v61, %v1996_v52 }
 0x690   :  { %v1990_v63 = vpop.xlane.xlu0 %1989 }
 0x691   :  { %2039 = vst.msk [vmem:[%s3568_s15 + $0x58] sm:$0xff] %vm2027_vm0, %v2022_v60  ;;  %v2019_v48 = vadd.f32 %v2095_v61, %v1990_v63 }
 0x692   :  { %v1992_v51 = vpop.xlane.xlu1 %1991 }
 0x693   :  { %2036 = vst.msk [vmem:[%s3568_s15 + $0x40] sm:$0xff] %vm2027_vm0, %v2019_v48  ;;  %v2020_v41 = vadd.f32 %v2095_v61, %v1992_v51 }
 0x695   :  { %2037 = vst.msk [vmem:[%s3568_s15 + $0x48] sm:$0xff] %vm2027_vm0, %v2020_v41 }
 0x6b9   :  { %v1998_v0 = vpop.xlane.xlu0 %1997 }
 0x6ba   :  { %v2023_v7 = vadd.f32 %v2095_v61, %v1998_v0 }
 0x6bb   :  { %v2000_v1 = vpop.xlane.xlu1 %1999 }
 0x6bc   :  { %2040 = vst.msk [vmem:[%s3568_s15 + $0x60] sm:$0xff] %vm2027_vm0, %v2023_v7  ;;  %v2024_v33 = vadd.f32 %v2095_v61, %v2000_v1 }
 0x6bd   :  { %v2002_v21 = vpop.xlane.xlu0 %2001 }
 0x6be   :  { %2041 = vst.msk [vmem:[%s3568_s15 + $0x68] sm:$0xff] %vm2027_vm0, %v2024_v33  ;;  %v2025_v36 = vadd.f32 %v2095_v61, %v2002_v21 }
 0x6bf   :  { %v2004_v34 = vpop.xlane.xlu1 %2003 }
 0x6c0   :  { %2042 = vst.msk [vmem:[%s3568_s15 + $0x70] sm:$0xff] %vm2027_vm0, %v2025_v36  ;;  %v2026_v54 = vadd.f32 %v2095_v61, %v2004_v34 }
 0x6c2   :  { %2043 = vst.msk [vmem:[%s3568_s15 + $0x78] sm:$0xff] %vm2027_vm0, %v2026_v54 }

</bundles_post_ra>
